<compile_context>
chip_gen: v7x
topology: tpu7x:2x2x1
jax: 0.10.0
libtpu: 0.0.40
codegen_flags: <defaults>
</compile_context>

<pallas_src>
from functools import partial

import numpy as np
import jax
import jax.numpy as jnp
from jax.experimental import pallas as pl
from jax.experimental.pallas import tpu as pltpu

# ---- module hyper-parameters (mirrors the PyTorch script) -------------------
hidden_size = 128
text = "\nTo be, or not to be, that is the question:\nWhether 'tis nobler in the mind to suffer\nThe slings and arrows of outrageous fortune,\nOr to take arms against a sea of troubles\nAnd by opposing end them.\n"
chars = sorted(set(text))
input_size = len(chars)
num_layers = 2
output_size = len(chars)


# ---- Pallas kernel -----------------------------------------------------------
def rnn_kernel(x_ref, h_ref, wih0_ref, b0_ref, whh0_ref, wih1_ref, whh1_ref,
               b1_ref, wfc_ref, bfc_ref, out_ref, hout_ref):
    """Full RNN forward in one kernel invocation (no grid).

    x_ref    : (T*Bp, Ip)  time-major, sublane/lane-padded input
    h_ref    : (2, Bp, H)  initial hidden state (layer 0, layer 1)
    wih0_ref : (Ip, H)     layer-0 input->hidden weight (transposed, row-padded)
    b0_ref   : (1, H)      layer-0 combined bias (b_ih0 + b_hh0)
    whh0_ref : (H, H)      layer-0 hidden->hidden weight (transposed)
    wih1_ref : (H, H)      layer-1 input->hidden weight (transposed)
    whh1_ref : (H, H)      layer-1 hidden->hidden weight (transposed)
    b1_ref   : (1, H)      layer-1 combined bias (b_ih1 + b_hh1)
    wfc_ref  : (H, Op)     fc weight (transposed, lane-padded)
    bfc_ref  : (1, Op)     fc bias (lane-padded)
    out_ref  : (Bp, Op)    fc(out[:, -1, :])
    hout_ref : (2, Bp, H)  final hidden state
    """
    Bp = h_ref.shape[1]
    H = h_ref.shape[2]
    T = x_ref.shape[0] // Bp

    # Layer-0 input projection for ALL timesteps in one MXU pass, bias folded in.
    xproj = jnp.dot(x_ref[...], wih0_ref[...],
                    preferred_element_type=jnp.float32) + b0_ref[...]  # (T*Bp, H)

    whh0 = whh0_ref[...]
    wih1 = wih1_ref[...]
    whh1 = whh1_ref[...]
    b1 = jnp.broadcast_to(b1_ref[...], (Bp, H))   # single splat, hoisted

    h0 = h_ref[0]
    h1 = h_ref[1]
    for t in range(T):  # static unroll -> static VMEM slices
        # Layer-1 recurrent dot first: independent of the h0 chain, so it
        # overlaps the layer-0 matmul + tanh latency.
        h1_rec = jnp.dot(h1, whh1, preferred_element_type=jnp.float32)
        # Layer 0: single MXU op (input projection precomputed above).
        h0 = jnp.tanh(xproj[t * Bp:(t + 1) * Bp, :]
                      + jnp.dot(h0, whh0, preferred_element_type=jnp.float32))
        # Layer 1: second dot only depends on the fresh h0.
        h1 = jnp.tanh(jnp.dot(h0, wih1, preferred_element_type=jnp.float32)
                      + h1_rec + b1)

    hout_ref[0] = h0
    hout_ref[1] = h1
    # fc on the last-timestep output of the top layer.
    out_ref[...] = (jnp.dot(h1, wfc_ref[...], preferred_element_type=jnp.float32)
                    + bfc_ref[...])


# ---- one-time weight preparation (cached across forward calls) ---------------
def prepare_params(params):
    """Transposes, bias folds and lane padding, done once off the latency path."""
    H = params["w_hh_l0"].shape[0]
    I = params["w_ih_l0"].shape[1]
    O = params["w_fc"].shape[0]
    Ip = pl.cdiv(I, 128) * 128
    Op = pl.cdiv(O, 128) * 128
    return {
        "wih0_t": jnp.pad(params["w_ih_l0"].T, ((0, Ip - I), (0, 0))),      # (Ip, H)
        "b0":     (params["b_ih_l0"] + params["b_hh_l0"]).reshape(1, H),     # (1, H)
        "whh0_t": jnp.asarray(params["w_hh_l0"].T),                          # (H, H)
        "wih1_t": jnp.asarray(params["w_ih_l1"].T),                          # (H, H)
        "whh1_t": jnp.asarray(params["w_hh_l1"].T),                          # (H, H)
        "b1":     (params["b_ih_l1"] + params["b_hh_l1"]).reshape(1, H),     # (1, H)
        "wfc_t":  jnp.pad(params["w_fc"].T, ((0, 0), (0, Op - O))),          # (H, Op)
        "bfc":    jnp.pad(params["b_fc"].reshape(1, O), ((0, 0), (0, Op - O))),
    }


# ---- wrapper -----------------------------------------------------------------
@partial(jax.jit, static_argnames=("out_dim",))
def rnn_model_forward(x, hidden, prep, out_dim):
    """x: (B, T, I) float32 (batch_first); hidden: (2, B, H). Returns (out, hidden)."""
    B, T, I = x.shape
    L, _, H = hidden.shape
    Ip = prep["wih0_t"].shape[0]
    Op = prep["wfc_t"].shape[1]
    Bp = max(8, pl.cdiv(B, 8) * 8)   # sublane-pad the batch

    # Pad once, go time-major, flatten (T, Bp) -> T*Bp rows for the pre-loop dot.
    x_p = jnp.pad(x, ((0, Bp - B), (0, 0), (0, Ip - I)))          # (Bp, T, Ip)
    x_tm = jnp.transpose(x_p, (1, 0, 2)).reshape(T * Bp, Ip)      # (T*Bp, Ip)
    hidden_p = jnp.pad(hidden, ((0, 0), (0, Bp - B), (0, 0)))     # (L, Bp, H)

    vmem = pl.BlockSpec(memory_space=pltpu.MemorySpace.VMEM)
    out_p, hout_p = pl.pallas_call(
        rnn_kernel,
        out_shape=(
            jax.ShapeDtypeStruct((Bp, Op), jnp.float32),
            jax.ShapeDtypeStruct((L, Bp, H), jnp.float32),
        ),
        in_specs=[vmem] * 10,
        out_specs=(vmem, vmem),
    )(x_tm, hidden_p, prep["wih0_t"], prep["b0"], prep["whh0_t"],
      prep["wih1_t"], prep["whh1_t"], prep["b1"], prep["wfc_t"], prep["bfc"])

    # Padded batch rows / lanes are sliced away here (do not use them unsliced).
    return out_p[:B, :out_dim], hout_p[:, :B, :]


# ---- pure-JAX reference (for correctness check) --------------------------------
def rnn_model_reference(x, hidden, params):
    B, T, I = x.shape
    h0 = hidden[0]
    h1 = hidden[1]
    for t in range(T):
        x_t = x[:, t, :]
        h0 = jnp.tanh(x_t @ params["w_ih_l0"].T + params["b_ih_l0"]
                      + h0 @ params["w_hh_l0"].T + params["b_hh_l0"])
        h1 = jnp.tanh(h0 @ params["w_ih_l1"].T + params["b_ih_l1"]
                      + h1 @ params["w_hh_l1"].T + params["b_hh_l1"])
    out = h1 @ params["w_fc"].T + params["b_fc"]
    return out, jnp.stack([h0, h1], axis=0)


# ---- deterministic parameter init (PyTorch-style U(-1/sqrt(H), 1/sqrt(H))) -----
def init_params(key, I, H, O):
    bound = 1.0 / np.sqrt(H)
    names_shapes = [
        ("w_ih_l0", (H, I)), ("w_hh_l0", (H, H)),
        ("b_ih_l0", (H,)),   ("b_hh_l0", (H,)),
        ("w_ih_l1", (H, H)), ("w_hh_l1", (H, H)),
        ("b_ih_l1", (H,)),   ("b_hh_l1", (H,)),
        ("w_fc", (O, H)),    ("b_fc", (O,)),
    ]
    params = {}
    keys = jax.random.split(key, len(names_shapes))
    for k, (name, shape) in zip(keys, names_shapes):
        params[name] = jax.random.uniform(
            k, shape, dtype=jnp.float32, minval=-bound, maxval=bound)
    return params


if __name__ == "__main__":
    B, T = 2, 8
    I, H, O = input_size, hidden_size, output_size

    key = jax.random.PRNGKey(0)
    kx, kh, kp = jax.random.split(key, 3)
    x = jax.random.normal(kx, (B, T, I), dtype=jnp.float32)
    hidden = jax.random.normal(kh, (num_layers, B, H), dtype=jnp.float32)
    params = init_params(kp, I, H, O)

    prep = prepare_params(params)   # one-time weight prep, reused across calls
    out, hidden_out = rnn_model_forward(x, hidden, prep, O)
    out = jax.block_until_ready(out)
    hidden_out = jax.block_until_ready(hidden_out)

    out_ref, hidden_ref = rnn_model_reference(x, hidden, params)
    assert out.shape == (B, O) and hidden_out.shape == (num_layers, B, H)
    np.testing.assert_allclose(np.asarray(out), np.asarray(out_ref),
                               rtol=1e-4, atol=1e-4)
    np.testing.assert_allclose(np.asarray(hidden_out), np.asarray(hidden_ref),
                               rtol=1e-4, atol=1e-4)
    print("KERNEL_OK")
</pallas_src>

<mosaic_0001>
module attributes {stable_mosaic.version = 11 : i64} {
  func.func @rnn_kernel(%arg0: memref<64x128xf32, #tpu.memory_space<vmem>>, %arg1: memref<2x8x128xf32, #tpu.memory_space<vmem>>, %arg2: memref<128x128xf32, #tpu.memory_space<vmem>>, %arg3: memref<1x128xf32, #tpu.memory_space<vmem>>, %arg4: memref<128x128xf32, #tpu.memory_space<vmem>>, %arg5: memref<128x128xf32, #tpu.memory_space<vmem>>, %arg6: memref<128x128xf32, #tpu.memory_space<vmem>>, %arg7: memref<1x128xf32, #tpu.memory_space<vmem>>, %arg8: memref<128x128xf32, #tpu.memory_space<vmem>>, %arg9: memref<1x128xf32, #tpu.memory_space<vmem>>, %arg10: memref<8x128xf32, #tpu.memory_space<vmem>>, %arg11: memref<2x8x128xf32, #tpu.memory_space<vmem>>) attributes {dimension_semantics = [], scalar_prefetch = 0 : i64, scratch_operands = 0 : i64, tpu.core_type = #tpu.core_type<tc>} {
    %c0 = arith.constant 0 : index
    %c0_0 = arith.constant 0 : index
    %0 = vector.load %arg0[%c0, %c0_0] : memref<64x128xf32, #tpu.memory_space<vmem>>, vector<64x128xf32>
    %c0_1 = arith.constant 0 : index
    %c0_2 = arith.constant 0 : index
    %1 = vector.load %arg2[%c0_1, %c0_2] : memref<128x128xf32, #tpu.memory_space<vmem>>, vector<128x128xf32>
    %cst = arith.constant dense<0.000000e+00> : vector<64x128xf32>
    %2 = tpu.matmul %0, %1, %cst {dimension_numbers = #tpu.dot_dimension_numbers<[1], [0], [0], [1], [0, 0, 1, 1], [], []>} : vector<64x128xf32>, vector<128x128xf32>, vector<64x128xf32> -> vector<64x128xf32>
    %c0_3 = arith.constant 0 : index
    %c0_4 = arith.constant 0 : index
    %3 = vector.load %arg3[%c0_3, %c0_4] : memref<1x128xf32, #tpu.memory_space<vmem>>, vector<1x128xf32>
    %4 = vector.broadcast %3 : vector<1x128xf32> to vector<64x128xf32>
    %5 = arith.addf %2, %4 : vector<64x128xf32>
    %c0_5 = arith.constant 0 : index
    %c0_6 = arith.constant 0 : index
    %6 = vector.load %arg4[%c0_5, %c0_6] : memref<128x128xf32, #tpu.memory_space<vmem>>, vector<128x128xf32>
    %c0_7 = arith.constant 0 : index
    %c0_8 = arith.constant 0 : index
    %7 = vector.load %arg5[%c0_7, %c0_8] : memref<128x128xf32, #tpu.memory_space<vmem>>, vector<128x128xf32>
    %c0_9 = arith.constant 0 : index
    %c0_10 = arith.constant 0 : index
    %8 = vector.load %arg6[%c0_9, %c0_10] : memref<128x128xf32, #tpu.memory_space<vmem>>, vector<128x128xf32>
    %c0_11 = arith.constant 0 : index
    %c0_12 = arith.constant 0 : index
    %9 = vector.load %arg7[%c0_11, %c0_12] : memref<1x128xf32, #tpu.memory_space<vmem>>, vector<1x128xf32>
    %10 = vector.shape_cast %9 : vector<1x128xf32> to vector<1x128xf32>
    %11 = vector.broadcast %10 : vector<1x128xf32> to vector<8x128xf32>
    %c0_13 = arith.constant 0 : index
    %c0_14 = arith.constant 0 : index
    %c0_15 = arith.constant 0 : index
    %12 = vector.load %arg1[%c0_13, %c0_14, %c0_15] : memref<2x8x128xf32, #tpu.memory_space<vmem>>, vector<1x8x128xf32>
    %13 = vector.shape_cast %12 : vector<1x8x128xf32> to vector<8x128xf32>
    %c1 = arith.constant 1 : index
    %c0_16 = arith.constant 0 : index
    %c0_17 = arith.constant 0 : index
    %14 = vector.load %arg1[%c1, %c0_16, %c0_17] : memref<2x8x128xf32, #tpu.memory_space<vmem>>, vector<1x8x128xf32>
    %15 = vector.shape_cast %14 : vector<1x8x128xf32> to vector<8x128xf32>
    %cst_18 = arith.constant dense<0.000000e+00> : vector<8x128xf32>
    %16 = tpu.matmul %15, %8, %cst_18 {dimension_numbers = #tpu.dot_dimension_numbers<[1], [0], [0], [1], [0, 0, 1, 1], [], []>} : vector<8x128xf32>, vector<128x128xf32>, vector<8x128xf32> -> vector<8x128xf32>
    %17 = vector.extract_strided_slice %5 {offsets = [0, 0], sizes = [8, 128], strides = [1, 1]} : vector<64x128xf32> to vector<8x128xf32>
    %cst_19 = arith.constant dense<0.000000e+00> : vector<8x128xf32>
    %18 = tpu.matmul %13, %6, %cst_19 {dimension_numbers = #tpu.dot_dimension_numbers<[1], [0], [0], [1], [0, 0, 1, 1], [], []>} : vector<8x128xf32>, vector<128x128xf32>, vector<8x128xf32> -> vector<8x128xf32>
    %19 = arith.addf %17, %18 : vector<8x128xf32>
    %20 = math.tanh %19 : vector<8x128xf32>
    %cst_20 = arith.constant dense<0.000000e+00> : vector<8x128xf32>
    %21 = tpu.matmul %20, %7, %cst_20 {dimension_numbers = #tpu.dot_dimension_numbers<[1], [0], [0], [1], [0, 0, 1, 1], [], []>} : vector<8x128xf32>, vector<128x128xf32>, vector<8x128xf32> -> vector<8x128xf32>
    %22 = arith.addf %21, %16 : vector<8x128xf32>
    %23 = arith.addf %22, %11 : vector<8x128xf32>
    %24 = math.tanh %23 : vector<8x128xf32>
    %cst_21 = arith.constant dense<0.000000e+00> : vector<8x128xf32>
    %25 = tpu.matmul %24, %8, %cst_21 {dimension_numbers = #tpu.dot_dimension_numbers<[1], [0], [0], [1], [0, 0, 1, 1], [], []>} : vector<8x128xf32>, vector<128x128xf32>, vector<8x128xf32> -> vector<8x128xf32>
    %26 = vector.extract_strided_slice %5 {offsets = [8, 0], sizes = [8, 128], strides = [1, 1]} : vector<64x128xf32> to vector<8x128xf32>
    %cst_22 = arith.constant dense<0.000000e+00> : vector<8x128xf32>
    %27 = tpu.matmul %20, %6, %cst_22 {dimension_numbers = #tpu.dot_dimension_numbers<[1], [0], [0], [1], [0, 0, 1, 1], [], []>} : vector<8x128xf32>, vector<128x128xf32>, vector<8x128xf32> -> vector<8x128xf32>
    %28 = arith.addf %26, %27 : vector<8x128xf32>
    %29 = math.tanh %28 : vector<8x128xf32>
    %cst_23 = arith.constant dense<0.000000e+00> : vector<8x128xf32>
    %30 = tpu.matmul %29, %7, %cst_23 {dimension_numbers = #tpu.dot_dimension_numbers<[1], [0], [0], [1], [0, 0, 1, 1], [], []>} : vector<8x128xf32>, vector<128x128xf32>, vector<8x128xf32> -> vector<8x128xf32>
    %31 = arith.addf %30, %25 : vector<8x128xf32>
    %32 = arith.addf %31, %11 : vector<8x128xf32>
    %33 = math.tanh %32 : vector<8x128xf32>
    %cst_24 = arith.constant dense<0.000000e+00> : vector<8x128xf32>
    %34 = tpu.matmul %33, %8, %cst_24 {dimension_numbers = #tpu.dot_dimension_numbers<[1], [0], [0], [1], [0, 0, 1, 1], [], []>} : vector<8x128xf32>, vector<128x128xf32>, vector<8x128xf32> -> vector<8x128xf32>
    %35 = vector.extract_strided_slice %5 {offsets = [16, 0], sizes = [8, 128], strides = [1, 1]} : vector<64x128xf32> to vector<8x128xf32>
    %cst_25 = arith.constant dense<0.000000e+00> : vector<8x128xf32>
    %36 = tpu.matmul %29, %6, %cst_25 {dimension_numbers = #tpu.dot_dimension_numbers<[1], [0], [0], [1], [0, 0, 1, 1], [], []>} : vector<8x128xf32>, vector<128x128xf32>, vector<8x128xf32> -> vector<8x128xf32>
    %37 = arith.addf %35, %36 : vector<8x128xf32>
    %38 = math.tanh %37 : vector<8x128xf32>
    %cst_26 = arith.constant dense<0.000000e+00> : vector<8x128xf32>
    %39 = tpu.matmul %38, %7, %cst_26 {dimension_numbers = #tpu.dot_dimension_numbers<[1], [0], [0], [1], [0, 0, 1, 1], [], []>} : vector<8x128xf32>, vector<128x128xf32>, vector<8x128xf32> -> vector<8x128xf32>
    %40 = arith.addf %39, %34 : vector<8x128xf32>
    %41 = arith.addf %40, %11 : vector<8x128xf32>
    %42 = math.tanh %41 : vector<8x128xf32>
    %cst_27 = arith.constant dense<0.000000e+00> : vector<8x128xf32>
    %43 = tpu.matmul %42, %8, %cst_27 {dimension_numbers = #tpu.dot_dimension_numbers<[1], [0], [0], [1], [0, 0, 1, 1], [], []>} : vector<8x128xf32>, vector<128x128xf32>, vector<8x128xf32> -> vector<8x128xf32>
    %44 = vector.extract_strided_slice %5 {offsets = [24, 0], sizes = [8, 128], strides = [1, 1]} : vector<64x128xf32> to vector<8x128xf32>
    %cst_28 = arith.constant dense<0.000000e+00> : vector<8x128xf32>
    %45 = tpu.matmul %38, %6, %cst_28 {dimension_numbers = #tpu.dot_dimension_numbers<[1], [0], [0], [1], [0, 0, 1, 1], [], []>} : vector<8x128xf32>, vector<128x128xf32>, vector<8x128xf32> -> vector<8x128xf32>
    %46 = arith.addf %44, %45 : vector<8x128xf32>
    %47 = math.tanh %46 : vector<8x128xf32>
    %cst_29 = arith.constant dense<0.000000e+00> : vector<8x128xf32>
    %48 = tpu.matmul %47, %7, %cst_29 {dimension_numbers = #tpu.dot_dimension_numbers<[1], [0], [0], [1], [0, 0, 1, 1], [], []>} : vector<8x128xf32>, vector<128x128xf32>, vector<8x128xf32> -> vector<8x128xf32>
    %49 = arith.addf %48, %43 : vector<8x128xf32>
    %50 = arith.addf %49, %11 : vector<8x128xf32>
    %51 = math.tanh %50 : vector<8x128xf32>
    %cst_30 = arith.constant dense<0.000000e+00> : vector<8x128xf32>
    %52 = tpu.matmul %51, %8, %cst_30 {dimension_numbers = #tpu.dot_dimension_numbers<[1], [0], [0], [1], [0, 0, 1, 1], [], []>} : vector<8x128xf32>, vector<128x128xf32>, vector<8x128xf32> -> vector<8x128xf32>
    %53 = vector.extract_strided_slice %5 {offsets = [32, 0], sizes = [8, 128], strides = [1, 1]} : vector<64x128xf32> to vector<8x128xf32>
    %cst_31 = arith.constant dense<0.000000e+00> : vector<8x128xf32>
    %54 = tpu.matmul %47, %6, %cst_31 {dimension_numbers = #tpu.dot_dimension_numbers<[1], [0], [0], [1], [0, 0, 1, 1], [], []>} : vector<8x128xf32>, vector<128x128xf32>, vector<8x128xf32> -> vector<8x128xf32>
    %55 = arith.addf %53, %54 : vector<8x128xf32>
    %56 = math.tanh %55 : vector<8x128xf32>
    %cst_32 = arith.constant dense<0.000000e+00> : vector<8x128xf32>
    %57 = tpu.matmul %56, %7, %cst_32 {dimension_numbers = #tpu.dot_dimension_numbers<[1], [0], [0], [1], [0, 0, 1, 1], [], []>} : vector<8x128xf32>, vector<128x128xf32>, vector<8x128xf32> -> vector<8x128xf32>
    %58 = arith.addf %57, %52 : vector<8x128xf32>
    %59 = arith.addf %58, %11 : vector<8x128xf32>
    %60 = math.tanh %59 : vector<8x128xf32>
    %cst_33 = arith.constant dense<0.000000e+00> : vector<8x128xf32>
    %61 = tpu.matmul %60, %8, %cst_33 {dimension_numbers = #tpu.dot_dimension_numbers<[1], [0], [0], [1], [0, 0, 1, 1], [], []>} : vector<8x128xf32>, vector<128x128xf32>, vector<8x128xf32> -> vector<8x128xf32>
    %62 = vector.extract_strided_slice %5 {offsets = [40, 0], sizes = [8, 128], strides = [1, 1]} : vector<64x128xf32> to vector<8x128xf32>
    %cst_34 = arith.constant dense<0.000000e+00> : vector<8x128xf32>
    %63 = tpu.matmul %56, %6, %cst_34 {dimension_numbers = #tpu.dot_dimension_numbers<[1], [0], [0], [1], [0, 0, 1, 1], [], []>} : vector<8x128xf32>, vector<128x128xf32>, vector<8x128xf32> -> vector<8x128xf32>
    %64 = arith.addf %62, %63 : vector<8x128xf32>
    %65 = math.tanh %64 : vector<8x128xf32>
    %cst_35 = arith.constant dense<0.000000e+00> : vector<8x128xf32>
    %66 = tpu.matmul %65, %7, %cst_35 {dimension_numbers = #tpu.dot_dimension_numbers<[1], [0], [0], [1], [0, 0, 1, 1], [], []>} : vector<8x128xf32>, vector<128x128xf32>, vector<8x128xf32> -> vector<8x128xf32>
    %67 = arith.addf %66, %61 : vector<8x128xf32>
    %68 = arith.addf %67, %11 : vector<8x128xf32>
    %69 = math.tanh %68 : vector<8x128xf32>
    %cst_36 = arith.constant dense<0.000000e+00> : vector<8x128xf32>
    %70 = tpu.matmul %69, %8, %cst_36 {dimension_numbers = #tpu.dot_dimension_numbers<[1], [0], [0], [1], [0, 0, 1, 1], [], []>} : vector<8x128xf32>, vector<128x128xf32>, vector<8x128xf32> -> vector<8x128xf32>
    %71 = vector.extract_strided_slice %5 {offsets = [48, 0], sizes = [8, 128], strides = [1, 1]} : vector<64x128xf32> to vector<8x128xf32>
    %cst_37 = arith.constant dense<0.000000e+00> : vector<8x128xf32>
    %72 = tpu.matmul %65, %6, %cst_37 {dimension_numbers = #tpu.dot_dimension_numbers<[1], [0], [0], [1], [0, 0, 1, 1], [], []>} : vector<8x128xf32>, vector<128x128xf32>, vector<8x128xf32> -> vector<8x128xf32>
    %73 = arith.addf %71, %72 : vector<8x128xf32>
    %74 = math.tanh %73 : vector<8x128xf32>
    %cst_38 = arith.constant dense<0.000000e+00> : vector<8x128xf32>
    %75 = tpu.matmul %74, %7, %cst_38 {dimension_numbers = #tpu.dot_dimension_numbers<[1], [0], [0], [1], [0, 0, 1, 1], [], []>} : vector<8x128xf32>, vector<128x128xf32>, vector<8x128xf32> -> vector<8x128xf32>
    %76 = arith.addf %75, %70 : vector<8x128xf32>
    %77 = arith.addf %76, %11 : vector<8x128xf32>
    %78 = math.tanh %77 : vector<8x128xf32>
    %cst_39 = arith.constant dense<0.000000e+00> : vector<8x128xf32>
    %79 = tpu.matmul %78, %8, %cst_39 {dimension_numbers = #tpu.dot_dimension_numbers<[1], [0], [0], [1], [0, 0, 1, 1], [], []>} : vector<8x128xf32>, vector<128x128xf32>, vector<8x128xf32> -> vector<8x128xf32>
    %80 = vector.extract_strided_slice %5 {offsets = [56, 0], sizes = [8, 128], strides = [1, 1]} : vector<64x128xf32> to vector<8x128xf32>
    %cst_40 = arith.constant dense<0.000000e+00> : vector<8x128xf32>
    %81 = tpu.matmul %74, %6, %cst_40 {dimension_numbers = #tpu.dot_dimension_numbers<[1], [0], [0], [1], [0, 0, 1, 1], [], []>} : vector<8x128xf32>, vector<128x128xf32>, vector<8x128xf32> -> vector<8x128xf32>
    %82 = arith.addf %80, %81 : vector<8x128xf32>
    %83 = math.tanh %82 : vector<8x128xf32>
    %cst_41 = arith.constant dense<0.000000e+00> : vector<8x128xf32>
    %84 = tpu.matmul %83, %7, %cst_41 {dimension_numbers = #tpu.dot_dimension_numbers<[1], [0], [0], [1], [0, 0, 1, 1], [], []>} : vector<8x128xf32>, vector<128x128xf32>, vector<8x128xf32> -> vector<8x128xf32>
    %85 = arith.addf %84, %79 : vector<8x128xf32>
    %86 = arith.addf %85, %11 : vector<8x128xf32>
    %87 = math.tanh %86 : vector<8x128xf32>
    %c0_42 = arith.constant 0 : index
    %c0_43 = arith.constant 0 : index
    %c0_44 = arith.constant 0 : index
    %88 = vector.load %arg11[%c0_42, %c0_43, %c0_44] : memref<2x8x128xf32, #tpu.memory_space<vmem>>, vector<1x8x128xf32>
    %89 = vector.shape_cast %88 : vector<1x8x128xf32> to vector<8x128xf32>
    %90 = vector.shape_cast %83 : vector<8x128xf32> to vector<1x8x128xf32>
    tpu.vector_store %arg11[%c0_42, %c0_43, %c0_44], %90 {strides = array<i32>} : memref<2x8x128xf32, #tpu.memory_space<vmem>>, vector<1x8x128xf32>,
    %c1_45 = arith.constant 1 : index
    %c0_46 = arith.constant 0 : index
    %c0_47 = arith.constant 0 : index
    %91 = vector.load %arg11[%c1_45, %c0_46, %c0_47] : memref<2x8x128xf32, #tpu.memory_space<vmem>>, vector<1x8x128xf32>
    %92 = vector.shape_cast %91 : vector<1x8x128xf32> to vector<8x128xf32>
    %93 = vector.shape_cast %87 : vector<8x128xf32> to vector<1x8x128xf32>
    tpu.vector_store %arg11[%c1_45, %c0_46, %c0_47], %93 {strides = array<i32>} : memref<2x8x128xf32, #tpu.memory_space<vmem>>, vector<1x8x128xf32>,
    %c0_48 = arith.constant 0 : index
    %c0_49 = arith.constant 0 : index
    %94 = vector.load %arg8[%c0_48, %c0_49] : memref<128x128xf32, #tpu.memory_space<vmem>>, vector<128x128xf32>
    %cst_50 = arith.constant dense<0.000000e+00> : vector<8x128xf32>
    %95 = tpu.matmul %87, %94, %cst_50 {dimension_numbers = #tpu.dot_dimension_numbers<[1], [0], [0], [1], [0, 0, 1, 1], [], []>} : vector<8x128xf32>, vector<128x128xf32>, vector<8x128xf32> -> vector<8x128xf32>
    %c0_51 = arith.constant 0 : index
    %c0_52 = arith.constant 0 : index
    %96 = vector.load %arg9[%c0_51, %c0_52] : memref<1x128xf32, #tpu.memory_space<vmem>>, vector<1x128xf32>
    %97 = vector.broadcast %96 : vector<1x128xf32> to vector<8x128xf32>
    %98 = arith.addf %95, %97 : vector<8x128xf32>
    %c0_53 = arith.constant 0 : index
    %c0_54 = arith.constant 0 : index
    %99 = vector.load %arg10[%c0_53, %c0_54] : memref<8x128xf32, #tpu.memory_space<vmem>>, vector<8x128xf32>
    tpu.vector_store %arg10[%c0_53, %c0_54], %98 {strides = array<i32>} : memref<8x128xf32, #tpu.memory_space<vmem>>, vector<8x128xf32>,
    return
  }
}

</mosaic_0001>

<bundles_post_ra>
// kernel: rnn_model_forward.1
= control target key start
LH: loop header
LB: loop body
LE: loop exit
PB: predicated region body
PF: predicated region fallthrough
CT: control target
= control target key end

     0   :  { %17 = vsyncpa [#allocation3], 0  ;;  %s5006_s0 = inlined_call_operand.vmem [shape: f32[64,128], index: 0, kind: input, shape index: {}]   ;;  %s5007_s1 = inlined_call_operand.vmem [shape: f32[2,8,128], index: 1, kind: input, shape index: {}]   ;;  %s5008_s2 = inlined_call_operand.vmem [shape: f32[128,128], index: 2, kind: input, shape index: {}]   ;;  %s5009_s3 = inlined_call_operand.vmem [shape: f32[1,128], index: 3, kind: input, shape index: {}]   ;;  %s5010_s4 = inlined_call_operand.hbm [shape: f32[128,128], index: 4, kind: input, shape index: {}]   ;;  %s5011_s5 = inlined_call_operand.hbm [shape: f32[128,128], index: 5, kind: input, shape index: {}]   ;;  %s5012_s6 = inlined_call_operand.hbm [shape: f32[128,128], index: 6, kind: input, shape index: {}]   ;;  %s5013_s7 = inlined_call_operand.vmem [shape: f32[1,128], index: 7, kind: input, shape index: {}]   ;;  %s5014_s8 = inlined_call_operand.hbm [shape: f32[128,128], index: 8, kind: input, shape index: {}]   ;;  %s5015_s9 = inlined_call_operand.vmem [shape: f32[1,128], index: 9, kind: input, shape index: {}]   ;;  %s5016_s10 = inlined_call_operand.vmem [shape: f32[8,128], index: 10, kind: output, shape index: {0}]   ;;  %s5017_s11 = inlined_call_operand.vmem [shape: f32[2,8,128], index: 11, kind: output, shape index: {1}]  }
   0x1   :  { %18 = vsyncpa [#allocation5], 0 }
   0x2   :  { %19 = vsyncpa [#allocation8], 0  ;;  %s4246_s17 = smov [#allocation4]   ;;  %s4247_s19 = smov [#allocation2]  }
   0x3   :  { %s45_s18 = sshll.u32 %s4246_s17, 4  ;;  %s33_s20 = sshll.u32 %s4247_s19, 4  ;;  %s46_s18 = int_to_ptr.vmem [resolvable:$true] %s45_s18  ;;  %s4315_s20 = int_to_ptr.vmem [resolvable:$true] %s33_s20 }
   0x4   :  { %s4152_s23 = scalar_lea.hbm %s5011_s5, 2048 }
   0x5   :  { %p4153_p0 = scmp.ne.s32.totalorder %s5011_s5, %s4152_s23  ;;  %p4156_p1 = scmp.lt.u32.totalorder %s4152_s23, %s5011_s5 }
   0x7   :  { %p4158_p2 = pnand %p4156_p1, %p4153_p0 }
   0x9   :  { %4161 = shalt.err (!%p4158_p2)
}
   0xa   :  { %s4162_s28 = scalar_lea.vmem %s46_s18, 2048  ;;  %p4167_p4 = scmp.lt.s32.totalorder %s46_s18, %s46_s18 }
   0xb   :  { %p4163_p3 = scmp.ne.s32.totalorder %s46_s18, %s4162_s28  ;;  %p4168_p5 = scmp.lt.s32.totalorder %s4162_s28, %s4162_s28 }
   0xd   :  { %p4169_p6 = por %p4168_p5, %p4167_p4 }
   0xf   :  { %p4170_p7 = pnand %p4169_p6, %p4163_p3 }
  0x11   :  { %4173 = shalt.err (!%p4170_p7)
}
  0x12   :  { %s4248_s29 = smov 128   ;;  %s4249_s30 = smov 8  }
  0x13   :  { %51 = dma.hbm_to_vmem [thread:$0]  %s5011_s5, 2048, %s46_s18, [#allocation5], %s4248_s29, %s4248_s29, %s4249_s30  }
  0x14   :  { %s4174_s16 = scalar_lea.hbm %s5010_s4, 2048 }
  0x15   :  { %p4175_p8 = scmp.ne.s32.totalorder %s5010_s4, %s4174_s16  ;;  %p4178_p9 = scmp.lt.u32.totalorder %s4174_s16, %s5010_s4 }
  0x17   :  { %p4180_p10 = pnand %p4178_p9, %p4175_p8 }
  0x19   :  { %4183 = shalt.err (!%p4180_p10)
}
  0x1a   :  { %s4184_s23 = scalar_lea.vmem %s4315_s20, 2048  ;;  %p4189_p12 = scmp.lt.s32.totalorder %s4315_s20, %s4315_s20 }
  0x1b   :  { %p4185_p11 = scmp.ne.s32.totalorder %s4315_s20, %s4184_s23  ;;  %p4190_p13 = scmp.lt.s32.totalorder %s4184_s23, %s4184_s23 }
  0x1d   :  { %p4191_p0 = por %p4190_p13, %p4189_p12 }
  0x1f   :  { %p4192_p1 = pnand %p4191_p0, %p4185_p11 }
  0x21   :  { %4195 = shalt.err (!%p4192_p1)
}
  0x22   :  { %39 = dma.hbm_to_vmem [thread:$0]  %s5010_s4, 2048, %s4315_s20, [#allocation3], %s4248_s29, %s4248_s29, %s4249_s30  }
  0x23   :  { %s4250_s24 = smov [#allocation6]   ;;  %s4251_s26 = smov [#allocation7]  }
  0x24   :  { %s57_s25 = sshll.u32 %s4250_s24, 4  ;;  %s71_s27 = sshll.u32 %s4251_s26, 4  ;;  %s58_s25 = int_to_ptr.vmem [resolvable:$true] %s57_s25  ;;  %s4352_s27 = int_to_ptr.vmem [resolvable:$true] %s71_s27 }
  0x25   :  { %s4196_s13 = scalar_lea.hbm %s5012_s6, 2048 }
  0x26   :  { %p4197_p2 = scmp.ne.s32.totalorder %s5012_s6, %s4196_s13  ;;  %p4200_p3 = scmp.lt.u32.totalorder %s4196_s13, %s5012_s6 }
  0x28   :  { %p4202_p4 = pnand %p4200_p3, %p4197_p2 }
  0x2a   :  { %4205 = shalt.err (!%p4202_p4)
}
  0x2b   :  { %s4206_s4 = scalar_lea.vmem %s58_s25, 2048  ;;  %p4211_p6 = scmp.lt.s32.totalorder %s58_s25, %s58_s25 }
  0x2c   :  { %p4207_p5 = scmp.ne.s32.totalorder %s58_s25, %s4206_s4  ;;  %p4212_p7 = scmp.lt.s32.totalorder %s4206_s4, %s4206_s4 }
  0x2e   :  { %p4213_p8 = por %p4212_p7, %p4211_p6 }
  0x30   :  { %p4214_p9 = pnand %p4213_p8, %p4207_p5 }
  0x32   :  { %4217 = shalt.err (!%p4214_p9)
}
  0x33   :  { %63 = dma.hbm_to_vmem [thread:$0]  %s5012_s6, 2048, %s58_s25, [#allocation5], %s4248_s29, %s4248_s29, %s4249_s30  }
  0x34   :  { %s4218_s23 = scalar_lea.hbm %s5014_s8, 2048 }
  0x35   :  { %p4219_p10 = scmp.ne.s32.totalorder %s5014_s8, %s4218_s23  ;;  %p4222_p11 = scmp.lt.u32.totalorder %s4218_s23, %s5014_s8 }
  0x37   :  { %p4224_p12 = pnand %p4222_p11, %p4219_p10 }
  0x39   :  { %4227 = shalt.err (!%p4224_p12)
}
  0x3a   :  { %s4228_s28 = scalar_lea.vmem %s4352_s27, 2048  ;;  %p4233_p0 = scmp.lt.s32.totalorder %s4352_s27, %s4352_s27 }
  0x3b   :  { %p4229_p13 = scmp.ne.s32.totalorder %s4352_s27, %s4228_s28  ;;  %p4234_p1 = scmp.lt.s32.totalorder %s4228_s28, %s4228_s28 }
  0x3d   :  { %p4235_p2 = por %p4234_p1, %p4233_p0 }
  0x3f   :  { %p4236_p3 = pnand %p4235_p2, %p4229_p13 }
  0x41   :  { %4239 = shalt.err (!%p4236_p3)
}
  0x42   :  { %77 = dma.hbm_to_vmem [thread:$0]  %s5014_s8, 2048, %s4352_s27, [#allocation8], %s4248_s29, %s4248_s29, %s4249_s30  }
  0x43   :  { %4240 = dma.done.wait [#allocation3], 2048  }
  0x44   :  { %4241 = vsyncadd [#allocation3], 4294965248 }
  0x45   :  { %4242 = dma.done.wait [#allocation5], 4096  }
  0x46   :  { %4243 = vsyncadd [#allocation5], 4294963200 }
  0x47   :  { %4244 = dma.done.wait [#allocation8], 2048  }
  0x48   :  { %4245 = vsyncadd [#allocation8], 4294965248  ;;  %v4252_v0 = vmov 0.0|0.0   ;;  %vm4253_vm0 = vmmov 0   ;;  %v4254_v1 = vmov 0.0   ;;  %v100_v2 = vld [vmem:[%s5008_s2] sm:$0xff] }
  0x49   :  { %3511 = vmatprep.subr.bf16.mxu1 %v4252_v0  ;;  %2636 = vmatprep.mubr.msk.f32.mxu1 %vm4253_vm0, %v4254_v1  ;;  %v101_v3 = vld [vmem:[%s5008_s2 + $0x8] sm:$0xff]  ;;  %v102_v4 = vld [vmem:[%s5008_s2 + $0x10] sm:$0xff]  ;;  %v103_v6 = vld [vmem:[%s5008_s2 + $0x18] sm:$0xff] }
  0x4a   :  { %v3479_v5 = vpack.c.bf16 %v101_v3, %v100_v2  ;;  %v3483_v7 = vpack.c.bf16 %v103_v6, %v102_v4  ;;  %v104_v8 = vld [vmem:[%s5008_s2 + $0x20] sm:$0xff]  ;;  %v105_v9 = vld [vmem:[%s5008_s2 + $0x28] sm:$0xff]  ;;  %v106_v12 = vld [vmem:[%s5008_s2 + $0x30] sm:$0xff] }
  0x4b   :  { %v3487_v10 = vpack.c.bf16 %v105_v9, %v104_v8  ;;  %v92_v11 = vld [vmem:[%s5006_s0] sm:$0xff]  ;;  %v107_v13 = vld [vmem:[%s5008_s2 + $0x38] sm:$0xff]  ;;  %v109_v16 = vld [vmem:[%s5008_s2 + $0x48] sm:$0xff] }
  0x4c   :  { %3480 = vmatprep.subr.bf16.mxu0 %v3479_v5  ;;  %2592 = vmatprep.mubr.f32.mxu0 %v92_v11  ;;  %v3491_v14 = vpack.c.bf16 %v107_v13, %v106_v12  ;;  %v108_v15 = vld [vmem:[%s5008_s2 + $0x40] sm:$0xff]  ;;  %v110_v18 = vld [vmem:[%s5008_s2 + $0x50] sm:$0xff]  ;;  %v111_v19 = vld [vmem:[%s5008_s2 + $0x58] sm:$0xff] }
  0x4d   :  { %3482 = vmatpush3.bf16.msra.mxu0 %v3479_v5  ;;  %v3495_v17 = vpack.c.bf16 %v109_v16, %v108_v15  ;;  %v260_v20 = vld [vmem:[#allocation6] sm:$0xff]  ;;  %v261_v21 = vld [vmem:[#allocation6 + $0x8] sm:$0xff]  ;;  %v262_v22 = vld [vmem:[#allocation6 + $0x10] sm:$0xff]  ;;  %v3499_v25 = vpack.c.bf16 %v111_v19, %v110_v18 }
  0x4e   :  { %3484 = vmatprep.subr.bf16.mxu0 %v3483_v7  ;;  %v263_v23 = vld [vmem:[#allocation6 + $0x18] sm:$0xff]  ;;  %v4431_v24 = vpack.c.bf16 %v261_v21, %v260_v20  ;;  %v112_v26 = vld [vmem:[%s5008_s2 + $0x60] sm:$0xff]  ;;  %v113_v28 = vld [vmem:[%s5008_s2 + $0x68] sm:$0xff] }
  0x4f   :  { %v4437_v27 = vpack.c.bf16 %v263_v23, %v262_v22  ;;  %v264_v29 = vld [vmem:[#allocation6 + $0x20] sm:$0xff]  ;;  %v265_v30 = vld [vmem:[#allocation6 + $0x28] sm:$0xff]  ;;  %v3503_v31 = vpack.c.bf16 %v113_v28, %v112_v26  ;;  %v114_v32 = vld [vmem:[%s5008_s2 + $0x70] sm:$0xff] }
  0x50   :  { %3513 = vmatpush3.bf16.msra.mxu1 %v4431_v24  ;;  %v4447_v33 = vpack.c.bf16 %v265_v30, %v264_v29  ;;  %v115_v34 = vld [vmem:[%s5008_s2 + $0x78] sm:$0xff]  ;;  %v266_v35 = vld [vmem:[#allocation6 + $0x30] sm:$0xff]  ;;  %v268_v39 = vld [vmem:[#allocation6 + $0x40] sm:$0xff] }
  0x51   :  { %3486 = vmatpush3.bf16.msra.mxu0 %v3483_v7  ;;  %3514 = vmatprep.subr.bf16.mxu1 %v4252_v0  ;;  %v267_v36 = vld [vmem:[#allocation6 + $0x38] sm:$0xff]  ;;  %v3507_v37 = vpack.c.bf16 %v115_v34, %v114_v32  ;;  %v269_v40 = vld [vmem:[#allocation6 + $0x48] sm:$0xff]  ;;  %v228_v41 = vld [vmem:[#allocation2] sm:$0xff] }
  0x52   :  { %3488 = vmatprep.subr.bf16.mxu0 %v3487_v10  ;;  %v4454_v38 = vpack.c.bf16 %v267_v36, %v266_v35  ;;  %v229_v42 = vld [vmem:[#allocation2 + $0x8] sm:$0xff]  ;;  %v4458_v43 = vpack.c.bf16 %v269_v40, %v268_v39  ;;  %v230_v46 = vld [vmem:[#allocation2 + $0x10] sm:$0xff]  ;;  %v231_v47 = vld [vmem:[#allocation2 + $0x18] sm:$0xff] }
  0x53   :  { %v93_v44 = vld [vmem:[%s5006_s0 + $0x8] sm:$0xff]  ;;  %v4464_v45 = vpack.c.bf16 %v229_v42, %v228_v41  ;;  %v94_v48 = vld [vmem:[%s5006_s0 + $0x10] sm:$0xff]  ;;  %v4473_v49 = vpack.c.bf16 %v231_v47, %v230_v46  ;;  %v95_v50 = vld [vmem:[%s5006_s0 + $0x18] sm:$0xff] }
  0x54   :  { %3516 = vmatpush3.bf16.msra.mxu1 %v4437_v27  ;;  %v232_v51 = vld [vmem:[#allocation2 + $0x20] sm:$0xff]  ;;  %v233_v52 = vld [vmem:[#allocation2 + $0x28] sm:$0xff]  ;;  %v234_v56 = vld [vmem:[#allocation2 + $0x30] sm:$0xff] }
  0x55   :  { %3490 = vmatpush3.bf16.msra.mxu0 %v3487_v10  ;;  %3517 = vmatprep.subr.bf16.mxu1 %v4252_v0  ;;  %v96_v53 = vld [vmem:[%s5006_s0 + $0x20] sm:$0xff]  ;;  %v4483_v54 = vpack.c.bf16 %v233_v52, %v232_v51  ;;  %v97_v55 = vld [vmem:[%s5006_s0 + $0x28] sm:$0xff]  ;;  %v235_v57 = vld [vmem:[#allocation2 + $0x38] sm:$0xff] }
  0x56   :  { %3492 = vmatprep.subr.bf16.mxu0 %v3491_v14  ;;  %v98_v58 = vld [vmem:[%s5006_s0 + $0x30] sm:$0xff]  ;;  %v4493_v59 = vpack.c.bf16 %v235_v57, %v234_v56  ;;  %v99_v60 = vld [vmem:[%s5006_s0 + $0x38] sm:$0xff]  ;;  %v236_v61 = vld [vmem:[#allocation2 + $0x40] sm:$0xff] }
  0x57   :  { %v237_v62 = vld [vmem:[#allocation2 + $0x48] sm:$0xff]  ;;  %v238_v2 = vld [vmem:[#allocation2 + $0x50] sm:$0xff]  ;;  %v239_v3 = vld [vmem:[#allocation2 + $0x58] sm:$0xff] }
  0x58   :  { %3519 = vmatpush3.bf16.msra.mxu1 %v4447_v33  ;;  %v4500_v63 = vpack.c.bf16 %v237_v62, %v236_v61  ;;  %v4506_v4 = vpack.c.bf16 %v239_v3, %v238_v2  ;;  %v240_v5 = vld [vmem:[#allocation2 + $0x60] sm:$0xff]  ;;  %v241_v6 = vld [vmem:[#allocation2 + $0x68] sm:$0xff]  ;;  %v242_v8 = vld [vmem:[#allocation2 + $0x70] sm:$0xff] }
  0x59   :  { %3494 = vmatpush3.bf16.msra.mxu0 %v3491_v14  ;;  %3520 = vmatprep.subr.bf16.mxu1 %v4252_v0  ;;  %v4510_v7 = vpack.c.bf16 %v241_v6, %v240_v5  ;;  %v243_v9 = vld [vmem:[#allocation2 + $0x78] sm:$0xff]  ;;  %v283_v11 = vld [vmem:[%s5007_s1] sm:$0xff]  ;;  %v270_v12 = vld [vmem:[#allocation6 + $0x50] sm:$0xff] }
  0x5a   :  { %3496 = vmatprep.subr.bf16.mxu0 %v3495_v17  ;;  %v4514_v10 = vpack.c.bf16 %v243_v9, %v242_v8  ;;  %v271_v13 = vld [vmem:[#allocation6 + $0x58] sm:$0xff]  ;;  %v272_v15 = vld [vmem:[#allocation6 + $0x60] sm:$0xff]  ;;  %v273_v16 = vld [vmem:[#allocation6 + $0x68] sm:$0xff] }
  0x5b   :  { %v4534_v14 = vpack.c.bf16 %v271_v13, %v270_v12  ;;  %v274_v18 = vld [vmem:[#allocation6 + $0x70] sm:$0xff]  ;;  %v275_v19 = vld [vmem:[#allocation6 + $0x78] sm:$0xff]  ;;  %v244_v21 = vld [vmem:[#allocation4] sm:$0xff] }
  0x5c   :  { %3522 = vmatpush3.bf16.msra.mxu1 %v4454_v38  ;;  %v4543_v20 = vpack.c.bf16 %v275_v19, %v274_v18  ;;  %v245_v22 = vld [vmem:[#allocation4 + $0x8] sm:$0xff]  ;;  %v246_v26 = vld [vmem:[#allocation4 + $0x10] sm:$0xff]  ;;  %v247_v28 = vld [vmem:[#allocation4 + $0x18] sm:$0xff] }
  0x5d   :  { %3498 = vmatpush3.bf16.msra.mxu0 %v3495_v17  ;;  %3523 = vmatprep.subr.bf16.mxu1 %v4252_v0  ;;  %v4539_v17 = vpack.c.bf16 %v273_v16, %v272_v15  ;;  %v2108_v23 = vld [vmem:[%s5007_s1 + $0x8] sm:$0xff]  ;;  %v4558_v29 = vpack.c.bf16 %v247_v28, %v246_v26  ;;  %v248_v30 = vld [vmem:[#allocation4 + $0x20] sm:$0xff]  ;;  %v250_v34 = vld [vmem:[#allocation4 + $0x30] sm:$0xff] }
  0x5e   :  { %3500 = vmatprep.subr.bf16.mxu0 %v3499_v25  ;;  %v251_v35 = vld [vmem:[#allocation4 + $0x38] sm:$0xff]  ;;  %v253_v39 = vld [vmem:[#allocation4 + $0x48] sm:$0xff]  ;;  %v254_v41 = vld [vmem:[#allocation4 + $0x50] sm:$0xff] }
  0x5f   :  { %v4568_v36 = vpack.c.bf16 %v251_v35, %v250_v34  ;;  %v255_v42 = vld [vmem:[#allocation4 + $0x58] sm:$0xff]  ;;  %v256_v46 = vld [vmem:[#allocation4 + $0x60] sm:$0xff]  ;;  %v257_v47 = vld [vmem:[#allocation4 + $0x68] sm:$0xff] }
  0x60   :  { %3525 = vmatpush3.bf16.msra.mxu1 %v4458_v43  ;;  %v259_v51 = vld [vmem:[#allocation4 + $0x78] sm:$0xff] }
  0x61   :  { %3502 = vmatpush3.bf16.msra.mxu0 %v3499_v25  ;;  %3526 = vmatprep.subr.bf16.mxu1 %v4252_v0  ;;  %v4552_v25 = vpack.c.bf16 %v245_v22, %v244_v21 }
  0x62   :  { %3504 = vmatprep.subr.bf16.mxu0 %v3503_v31 }
  0x64   :  { %3528 = vmatpush3.bf16.msra.mxu1 %v4534_v14 }
  0x65   :  { %3506 = vmatpush3.bf16.msra.mxu0 %v3503_v31  ;;  %3529 = vmatprep.subr.bf16.mxu1 %v4252_v0  ;;  %v249_v31 = vld [vmem:[#allocation4 + $0x28] sm:$0xff] }
  0x66   :  { %3508 = vmatprep.subr.bf16.mxu0 %v3507_v37  ;;  %v4564_v32 = vpack.c.bf16 %v249_v31, %v248_v30 }
  0x68   :  { %3531 = vmatpush3.bf16.msra.mxu1 %v4539_v17 }
  0x69   :  { %3510 = vmatpush3.bf16.msra.mxu0 %v3507_v37  ;;  %3532 = vmatprep.subr.bf16.mxu1 %v4252_v0  ;;  %v252_v37 = vld [vmem:[#allocation4 + $0x40] sm:$0xff] }
  0x6a   :  { %3535 = vmatprep.subr.bf16.mxu0 %v4252_v0  ;;  %v4572_v40 = vpack.c.bf16 %v253_v39, %v252_v37 }
  0x6c   :  { %2593 = vmatmul.mubr.f32.vlgmr.msra.gmra.mrb[0].mxu0 %v93_v44  ;;  %3534 = vmatpush3.bf16.msra.mxu1 %v4543_v20  ;;  %v4577_v44 = vpack.c.bf16 %v255_v42, %v254_v41 }
  0x6d   :  { %3537 = vmatpush3.bf16.msra.mxu0 %v4464_v45  ;;  %2595 = vmatprep.mubr.f32.mxu0 %v94_v48  ;;  %v258_v48 = vld [vmem:[#allocation4 + $0x70] sm:$0xff] }
  0x6e   :  { %3538 = vmatprep.subr.bf16.mxu0 %v4252_v0  ;;  %3559 = vmatprep.subr.bf16.mxu1 %v4252_v0  ;;  %v4584_v52 = vpack.c.bf16 %v259_v51, %v258_v48 }
  0x6f   :  { %2637 = vmatmul.mubr.f32.vlgmr.msra.gmra.mrb[0].mxu1 %v2108_v23  ;;  %v4645_v23 = vld [vmem:[%s5013_s7] ss:$0 sm:$0xff] }
  0x70   :  { %2596 = vmatmul.mubr.f32.gmra.mrb[2].mxu0 %v95_v50  ;;  %3561 = vmatpush3.bf16.msra.mxu1 %v4552_v25  ;;  %v4581_v50 = vpack.c.bf16 %v257_v47, %v256_v46 }
  0x71   :  { %3540 = vmatpush3.bf16.msra.mxu0 %v4473_v49  ;;  %2598 = vmatprep.mubr.f32.mxu0 %v96_v53  ;;  %v2106_v53 = vld [vmem:[%s5009_s3] ss:$0 sm:$0xff] }
  0x72   :  { %3541 = vmatprep.subr.bf16.mxu0 %v4252_v0  ;;  %2706 = vmatprep.mubr.msk.f32.mxu1 %vm4253_vm0, %v4254_v1 }
  0x73   :  { %3562 = vmatprep.subr.bf16.mxu1 %v4252_v0 }
  0x74   :  { %2599 = vmatmul.mubr.f32.gmra.mrb[4].mxu0 %v97_v55  ;;  %3564 = vmatpush3.bf16.msra.mxu1 %v4558_v29 }
  0x75   :  { %3543 = vmatpush3.bf16.msra.mxu0 %v4483_v54  ;;  %2601 = vmatprep.mubr.f32.mxu0 %v98_v58 }
  0x76   :  { %3544 = vmatprep.subr.bf16.mxu0 %v4252_v0  ;;  %3565 = vmatprep.subr.bf16.mxu1 %v4252_v0 }
  0x78   :  { %2602 = vmatmul.mubr.f32.gmra.mrb[6].mxu0 %v99_v60  ;;  %3567 = vmatpush3.bf16.msra.mxu1 %v4564_v32 }
  0x79   :  { %3546 = vmatpush3.bf16.msra.mxu0 %v4493_v59  ;;  %2671 = vmatprep.mubr.msk.f32.mxu0 %vm4253_vm0, %v4254_v1 }
  0x7a   :  { %3547 = vmatprep.subr.bf16.mxu0 %v4252_v0  ;;  %3568 = vmatprep.subr.bf16.mxu1 %v4252_v0 }
  0x7c   :  { %3570 = vmatpush3.bf16.msra.mxu1 %v4568_v36 }
  0x7d   :  { %3549 = vmatpush3.bf16.msra.mxu0 %v4500_v63  ;;  %3571 = vmatprep.subr.bf16.mxu1 %v4252_v0 }
  0x7e   :  { %3550 = vmatprep.subr.bf16.mxu0 %v4252_v0 }
  0x80   :  { %3573 = vmatpush3.bf16.msra.mxu1 %v4572_v40 }
  0x81   :  { %3552 = vmatpush3.bf16.msra.mxu0 %v4506_v4  ;;  %3574 = vmatprep.subr.bf16.mxu1 %v4252_v0 }
  0x82   :  { %3553 = vmatprep.subr.bf16.mxu0 %v4252_v0 }
  0x84   :  { %3576 = vmatpush3.bf16.msra.mxu1 %v4577_v44 }
  0x85   :  { %3555 = vmatpush3.bf16.msra.mxu0 %v4510_v7  ;;  %3577 = vmatprep.subr.bf16.mxu1 %v4252_v0 }
  0x86   :  { %3556 = vmatprep.subr.bf16.mxu0 %v4252_v0 }
  0x88   :  { %3579 = vmatpush3.bf16.msra.mxu1 %v4581_v50 }
  0x89   :  { %3558 = vmatpush3.bf16.msra.mxu0 %v4514_v10  ;;  %3580 = vmatprep.subr.bf16.mxu1 %v4252_v0 }
  0x8a   :  { %3583 = vmatprep.subr.bf16.mxu0 %v4252_v0 }
  0x8c   :  { %2672 = vmatmul.mubr.f32.vlgmr.msra.gmra.mrb[8].mxu0 %v283_v11  ;;  %3582 = vmatpush3.bf16.msra.mxu1 %v4584_v52 }
  0x8d   :  { %3585 = vmatpush3.bf16.msra.mxu0 %v4431_v24  ;;  %2741 = vmatprep.mubr.msk.f32.mxu0 %vm4253_vm0, %v4254_v1 }
  0x8e   :  { %3586 = vmatprep.subr.bf16.mxu0 %v4252_v0  ;;  %3607 = vmatprep.subr.bf16.mxu1 %v4252_v0 }
  0x91   :  { %3588 = vmatpush3.bf16.msra.mxu0 %v4437_v27 }
  0x92   :  { %3589 = vmatprep.subr.bf16.mxu0 %v4252_v0 }
  0x95   :  { %3591 = vmatpush3.bf16.msra.mxu0 %v4447_v33 }
  0x96   :  { %3592 = vmatprep.subr.bf16.mxu0 %v4252_v0 }
  0x99   :  { %3594 = vmatpush3.bf16.msra.mxu0 %v4454_v38 }
  0x9a   :  { %3595 = vmatprep.subr.bf16.mxu0 %v4252_v0 }
  0x9d   :  { %3597 = vmatpush3.bf16.msra.mxu0 %v4458_v43 }
  0x9e   :  { %3598 = vmatprep.subr.bf16.mxu0 %v4252_v0 }
  0xa1   :  { %3600 = vmatpush3.bf16.msra.mxu0 %v4534_v14 }
  0xa2   :  { %3601 = vmatprep.subr.bf16.mxu0 %v4252_v0 }
  0xa5   :  { %3603 = vmatpush3.bf16.msra.mxu0 %v4539_v17 }
  0xa6   :  { %3604 = vmatprep.subr.bf16.mxu0 %v4252_v0 }
  0xa9   :  { %3606 = vmatpush3.bf16.msra.mxu0 %v4543_v20 }
  0xaa   :  { %3631 = vmatprep.subr.bf16.mxu0 %v4252_v0 }
 0x13f   :  { %v2594_v55 = vpop.f32.mrb[0].mxu0 }
 0x140   :  { %v4592_v56 = vadd.f32 %v2594_v55, %v2106_v53  ;;  %v189_v57 = vpop.f32.mrb[1].mxu0 }
 0x141   :  { %v190_v13 = vadd.f32 %v2106_v53, %v189_v57 }
 0x142   :  { %v352_v21 = vpop.f32.mrb[0].mxu1 }
 0x143   :  { %v2597_v58 = vpop.f32.mrb[2].mxu0  ;;  %v2638_v22 = vpop.f32.mrb[1].mxu1 }
 0x144   :  { %v4594_v60 = vadd.f32 %v2597_v58, %v2106_v53  ;;  %v199_v61 = vpop.f32.mrb[3].mxu0 }
 0x145   :  { %v4596_v62 = vadd.f32 %v2106_v53, %v199_v61 }
 0x147   :  { %v2600_v2 = vpop.f32.mrb[4].mxu0 }
 0x148   :  { %v4598_v3 = vadd.f32 %v2600_v2, %v2106_v53  ;;  %v209_v5 = vpop.f32.mrb[5].mxu0 }
 0x149   :  { %v4600_v6 = vadd.f32 %v2106_v53, %v209_v5 }
 0x14b   :  { %v2603_v8 = vpop.f32.mrb[6].mxu0 }
 0x14c   :  { %v4602_v9 = vadd.f32 %v2603_v8, %v2106_v53  ;;  %v219_v11 = vpop.f32.mrb[7].mxu0 }
 0x14d   :  { %v4604_v12 = vadd.f32 %v2106_v53, %v219_v11 }
 0x15f   :  { %v422_v15 = vpop.f32.mrb[8].mxu0 }
 0x160   :  { %v426_v16 = vadd.f32 %v422_v15, %v190_v13  ;;  %v2673_v18 = vpop.f32.mrb[9].mxu0 }
 0x162   :  { %4120 = vtanh.f32 %v426_v16 }
 0x16c   :  { %v4121_v19 = vpop.eup %4120 }
 0x16d   :  { %2707 = vmatmul.mubr.f32.vlgmr.msra.gmra.mrb[2].mxu1 %v4121_v19 }
 0x16e   :  { %3609 = vmatpush3.bf16.msra.mxu1 %v4464_v45  ;;  %2776 = vmatprep.mubr.msk.f32.mxu1 %vm4253_vm0, %v4254_v1 }
 0x16f   :  { %3610 = vmatprep.subr.bf16.mxu1 %v4252_v0 }
 0x172   :  { %3612 = vmatpush3.bf16.msra.mxu1 %v4473_v49 }
 0x173   :  { %3613 = vmatprep.subr.bf16.mxu1 %v4252_v0 }
 0x176   :  { %3615 = vmatpush3.bf16.msra.mxu1 %v4483_v54 }
 0x177   :  { %3616 = vmatprep.subr.bf16.mxu1 %v4252_v0 }
 0x17a   :  { %3618 = vmatpush3.bf16.msra.mxu1 %v4493_v59 }
 0x17b   :  { %3619 = vmatprep.subr.bf16.mxu1 %v4252_v0 }
 0x17e   :  { %3621 = vmatpush3.bf16.msra.mxu1 %v4500_v63 }
 0x17f   :  { %3622 = vmatprep.subr.bf16.mxu1 %v4252_v0 }
 0x182   :  { %3624 = vmatpush3.bf16.msra.mxu1 %v4506_v4 }
 0x183   :  { %3625 = vmatprep.subr.bf16.mxu1 %v4252_v0 }
 0x186   :  { %3627 = vmatpush3.bf16.msra.mxu1 %v4510_v7 }
 0x187   :  { %3628 = vmatprep.subr.bf16.mxu1 %v4252_v0 }
 0x18a   :  { %3630 = vmatpush3.bf16.msra.mxu1 %v4514_v10 }
 0x18b   :  { %3655 = vmatprep.subr.bf16.mxu1 %v4252_v0 }
 0x18d   :  { %2777 = vmatmul.mubr.f32.vlgmr.msra.gmra.mrb[4].mxu1 %v4121_v19 }
 0x18e   :  { %3657 = vmatpush3.bf16.msra.mxu1 %v4431_v24  ;;  %2846 = vmatprep.mubr.msk.f32.mxu1 %vm4253_vm0, %v4254_v1 }
 0x18f   :  { %3658 = vmatprep.subr.bf16.mxu1 %v4252_v0 }
 0x192   :  { %3660 = vmatpush3.bf16.msra.mxu1 %v4437_v27 }
 0x193   :  { %3661 = vmatprep.subr.bf16.mxu1 %v4252_v0 }
 0x196   :  { %3663 = vmatpush3.bf16.msra.mxu1 %v4447_v33 }
 0x197   :  { %3664 = vmatprep.subr.bf16.mxu1 %v4252_v0 }
 0x19a   :  { %3666 = vmatpush3.bf16.msra.mxu1 %v4454_v38 }
 0x19b   :  { %3667 = vmatprep.subr.bf16.mxu1 %v4252_v0 }
 0x19e   :  { %3669 = vmatpush3.bf16.msra.mxu1 %v4458_v43 }
 0x19f   :  { %3670 = vmatprep.subr.bf16.mxu1 %v4252_v0 }
 0x1a2   :  { %3672 = vmatpush3.bf16.msra.mxu1 %v4534_v14 }
 0x1a3   :  { %3673 = vmatprep.subr.bf16.mxu1 %v4252_v0 }
 0x1a6   :  { %3675 = vmatpush3.bf16.msra.mxu1 %v4539_v17 }
 0x1a7   :  { %3676 = vmatprep.subr.bf16.mxu1 %v4252_v0 }
 0x1aa   :  { %3678 = vmatpush3.bf16.msra.mxu1 %v4543_v20 }
 0x1ab   :  { %3703 = vmatprep.subr.bf16.mxu1 %v4252_v0 }
 0x240   :  { %v494_v26 = vpop.f32.mrb[2].mxu1 }
 0x241   :  { %v495_v28 = vadd.f32 %v494_v26, %v352_v21  ;;  %v2708_v30 = vpop.f32.mrb[3].mxu1 }
 0x243   :  { %v498_v31 = vadd.f32 %v4645_v23, %v495_v28 }
 0x245   :  { %4122 = vtanh.f32 %v498_v31 }
 0x24f   :  { %v4123_v34 = vpop.eup %4122 }
 0x250   :  { %2742 = vmatmul.mubr.f32.vlgmr.msra.gmra.mrb[10].mxu0 %v4123_v34 }
 0x251   :  { %3633 = vmatpush3.bf16.msra.mxu0 %v4552_v25  ;;  %2811 = vmatprep.mubr.msk.f32.mxu0 %vm4253_vm0, %v4254_v1 }
 0x252   :  { %3634 = vmatprep.subr.bf16.mxu0 %v4252_v0 }
 0x255   :  { %3636 = vmatpush3.bf16.msra.mxu0 %v4558_v29 }
 0x256   :  { %3637 = vmatprep.subr.bf16.mxu0 %v4252_v0 }
 0x259   :  { %3639 = vmatpush3.bf16.msra.mxu0 %v4564_v32 }
 0x25a   :  { %3640 = vmatprep.subr.bf16.mxu0 %v4252_v0 }
 0x25d   :  { %3642 = vmatpush3.bf16.msra.mxu0 %v4568_v36 }
 0x25e   :  { %3643 = vmatprep.subr.bf16.mxu0 %v4252_v0 }
 0x260   :  { %v636_v35 = vpop.f32.mrb[4].mxu1 }
 0x261   :  { %v640_v37 = vadd.f32 %v636_v35, %v4592_v56  ;;  %v2778_v39 = vpop.f32.mrb[5].mxu1  ;;  %3645 = vmatpush3.bf16.msra.mxu0 %v4572_v40 }
 0x262   :  { %3646 = vmatprep.subr.bf16.mxu0 %v4252_v0 }
 0x263   :  { %4124 = vtanh.f32 %v640_v37 }
 0x265   :  { %3648 = vmatpush3.bf16.msra.mxu0 %v4577_v44 }
 0x266   :  { %3649 = vmatprep.subr.bf16.mxu0 %v4252_v0 }
 0x269   :  { %3651 = vmatpush3.bf16.msra.mxu0 %v4581_v50 }
 0x26a   :  { %3652 = vmatprep.subr.bf16.mxu0 %v4252_v0 }
 0x26d   :  { %3654 = vmatpush3.bf16.msra.mxu0 %v4584_v52  ;;  %v4125_v41 = vpop.eup %4124 }
 0x26e   :  { %3679 = vmatprep.subr.bf16.mxu0 %v4252_v0 }
 0x270   :  { %2812 = vmatmul.mubr.f32.vlgmr.msra.gmra.mrb[12].mxu0 %v4125_v41 }
 0x271   :  { %3681 = vmatpush3.bf16.msra.mxu0 %v4464_v45  ;;  %2881 = vmatprep.mubr.msk.f32.mxu0 %vm4253_vm0, %v4254_v1 }
 0x272   :  { %3682 = vmatprep.subr.bf16.mxu0 %v4252_v0 }
 0x275   :  { %3684 = vmatpush3.bf16.msra.mxu0 %v4473_v49 }
 0x276   :  { %3685 = vmatprep.subr.bf16.mxu0 %v4252_v0 }
 0x279   :  { %3687 = vmatpush3.bf16.msra.mxu0 %v4483_v54 }
 0x27a   :  { %3688 = vmatprep.subr.bf16.mxu0 %v4252_v0 }
 0x27d   :  { %3690 = vmatpush3.bf16.msra.mxu0 %v4493_v59 }
 0x27e   :  { %3691 = vmatprep.subr.bf16.mxu0 %v4252_v0 }
 0x281   :  { %3693 = vmatpush3.bf16.msra.mxu0 %v4500_v63 }
 0x282   :  { %3694 = vmatprep.subr.bf16.mxu0 %v4252_v0 }
 0x285   :  { %3696 = vmatpush3.bf16.msra.mxu0 %v4506_v4 }
 0x286   :  { %3697 = vmatprep.subr.bf16.mxu0 %v4252_v0 }
 0x289   :  { %3699 = vmatpush3.bf16.msra.mxu0 %v4510_v7 }
 0x28a   :  { %3700 = vmatprep.subr.bf16.mxu0 %v4252_v0 }
 0x28d   :  { %3702 = vmatpush3.bf16.msra.mxu0 %v4514_v10 }
 0x28e   :  { %3727 = vmatprep.subr.bf16.mxu0 %v4252_v0 }
 0x290   :  { %2882 = vmatmul.mubr.f32.vlgmr.msra.gmra.mrb[14].mxu0 %v4125_v41 }
 0x291   :  { %3729 = vmatpush3.bf16.msra.mxu0 %v4431_v24  ;;  %2951 = vmatprep.mubr.msk.f32.mxu0 %vm4253_vm0, %v4254_v1 }
 0x292   :  { %3730 = vmatprep.subr.bf16.mxu0 %v4252_v0 }
 0x295   :  { %3732 = vmatpush3.bf16.msra.mxu0 %v4437_v27 }
 0x296   :  { %3733 = vmatprep.subr.bf16.mxu0 %v4252_v0 }
 0x299   :  { %3735 = vmatpush3.bf16.msra.mxu0 %v4447_v33 }
 0x29a   :  { %3736 = vmatprep.subr.bf16.mxu0 %v4252_v0 }
 0x29d   :  { %3738 = vmatpush3.bf16.msra.mxu0 %v4454_v38 }
 0x29e   :  { %3739 = vmatprep.subr.bf16.mxu0 %v4252_v0 }
 0x2a1   :  { %3741 = vmatpush3.bf16.msra.mxu0 %v4458_v43 }
 0x2a2   :  { %3742 = vmatprep.subr.bf16.mxu0 %v4252_v0 }
 0x2a5   :  { %3744 = vmatpush3.bf16.msra.mxu0 %v4534_v14 }
 0x2a6   :  { %3745 = vmatprep.subr.bf16.mxu0 %v4252_v0 }
 0x2a9   :  { %3747 = vmatpush3.bf16.msra.mxu0 %v4539_v17 }
 0x2aa   :  { %3748 = vmatprep.subr.bf16.mxu0 %v4252_v0 }
 0x2ad   :  { %3750 = vmatpush3.bf16.msra.mxu0 %v4543_v20 }
 0x2ae   :  { %3775 = vmatprep.subr.bf16.mxu0 %v4252_v0 }
 0x323   :  { %v566_v42 = vpop.f32.mrb[10].mxu0 }
 0x324   :  { %v2743_v46 = vpop.f32.mrb[11].mxu0 }
 0x343   :  { %v708_v47 = vpop.f32.mrb[12].mxu0 }
 0x344   :  { %v709_v48 = vadd.f32 %v708_v47, %v566_v42  ;;  %v2813_v51 = vpop.f32.mrb[13].mxu0 }
 0x346   :  { %v712_v53 = vadd.f32 %v4645_v23, %v709_v48 }
 0x348   :  { %4126 = vtanh.f32 %v712_v53 }
 0x352   :  { %v4127_v55 = vpop.eup %4126 }
 0x353   :  { %2847 = vmatmul.mubr.f32.vlgmr.msra.gmra.mrb[6].mxu1 %v4127_v55 }
 0x354   :  { %3705 = vmatpush3.bf16.msra.mxu1 %v4552_v25  ;;  %2916 = vmatprep.mubr.msk.f32.mxu1 %vm4253_vm0, %v4254_v1 }
 0x355   :  { %3706 = vmatprep.subr.bf16.mxu1 %v4252_v0 }
 0x358   :  { %3708 = vmatpush3.bf16.msra.mxu1 %v4558_v29 }
 0x359   :  { %3709 = vmatprep.subr.bf16.mxu1 %v4252_v0 }
 0x35c   :  { %3711 = vmatpush3.bf16.msra.mxu1 %v4564_v32 }
 0x35d   :  { %3712 = vmatprep.subr.bf16.mxu1 %v4252_v0 }
 0x360   :  { %3714 = vmatpush3.bf16.msra.mxu1 %v4568_v36 }
 0x361   :  { %3715 = vmatprep.subr.bf16.mxu1 %v4252_v0 }
 0x363   :  { %v850_v56 = vpop.f32.mrb[14].mxu0 }
 0x364   :  { %v854_v57 = vadd.f32 %v850_v56, %v4596_v62  ;;  %3717 = vmatpush3.bf16.msra.mxu1 %v4572_v40  ;;  %v2883_v58 = vpop.f32.mrb[15].mxu0 }
 0x365   :  { %3718 = vmatprep.subr.bf16.mxu1 %v4252_v0 }
 0x366   :  { %4128 = vtanh.f32 %v854_v57 }
 0x368   :  { %3720 = vmatpush3.bf16.msra.mxu1 %v4577_v44 }
 0x369   :  { %3721 = vmatprep.subr.bf16.mxu1 %v4252_v0 }
 0x36c   :  { %3723 = vmatpush3.bf16.msra.mxu1 %v4581_v50 }
 0x36d   :  { %3724 = vmatprep.subr.bf16.mxu1 %v4252_v0 }
 0x370   :  { %v4129_v61 = vpop.eup %4128  ;;  %3726 = vmatpush3.bf16.msra.mxu1 %v4584_v52 }
 0x371   :  { %3751 = vmatprep.subr.bf16.mxu1 %v4252_v0 }
 0x373   :  { %2917 = vmatmul.mubr.f32.vlgmr.msra.gmra.mrb[8].mxu1 %v4129_v61 }
 0x374   :  { %3753 = vmatpush3.bf16.msra.mxu1 %v4464_v45  ;;  %2986 = vmatprep.mubr.msk.f32.mxu1 %vm4253_vm0, %v4254_v1 }
 0x375   :  { %3754 = vmatprep.subr.bf16.mxu1 %v4252_v0 }
 0x378   :  { %3756 = vmatpush3.bf16.msra.mxu1 %v4473_v49 }
 0x379   :  { %3757 = vmatprep.subr.bf16.mxu1 %v4252_v0 }
 0x37c   :  { %3759 = vmatpush3.bf16.msra.mxu1 %v4483_v54 }
 0x37d   :  { %3760 = vmatprep.subr.bf16.mxu1 %v4252_v0 }
 0x380   :  { %3762 = vmatpush3.bf16.msra.mxu1 %v4493_v59 }
 0x381   :  { %3763 = vmatprep.subr.bf16.mxu1 %v4252_v0 }
 0x384   :  { %3765 = vmatpush3.bf16.msra.mxu1 %v4500_v63 }
 0x385   :  { %3766 = vmatprep.subr.bf16.mxu1 %v4252_v0 }
 0x388   :  { %3768 = vmatpush3.bf16.msra.mxu1 %v4506_v4 }
 0x389   :  { %3769 = vmatprep.subr.bf16.mxu1 %v4252_v0 }
 0x38c   :  { %3771 = vmatpush3.bf16.msra.mxu1 %v4510_v7 }
 0x38d   :  { %3772 = vmatprep.subr.bf16.mxu1 %v4252_v0 }
 0x390   :  { %3774 = vmatpush3.bf16.msra.mxu1 %v4514_v10 }
 0x391   :  { %3799 = vmatprep.subr.bf16.mxu1 %v4252_v0 }
 0x393   :  { %2987 = vmatmul.mubr.f32.vlgmr.msra.gmra.mrb[10].mxu1 %v4129_v61 }
 0x394   :  { %3801 = vmatpush3.bf16.msra.mxu1 %v4431_v24  ;;  %3056 = vmatprep.mubr.msk.f32.mxu1 %vm4253_vm0, %v4254_v1 }
 0x395   :  { %3802 = vmatprep.subr.bf16.mxu1 %v4252_v0 }
 0x398   :  { %3804 = vmatpush3.bf16.msra.mxu1 %v4437_v27 }
 0x399   :  { %3805 = vmatprep.subr.bf16.mxu1 %v4252_v0 }
 0x39c   :  { %3807 = vmatpush3.bf16.msra.mxu1 %v4447_v33 }
 0x39d   :  { %3808 = vmatprep.subr.bf16.mxu1 %v4252_v0 }
 0x3a0   :  { %3810 = vmatpush3.bf16.msra.mxu1 %v4454_v38 }
 0x3a1   :  { %3811 = vmatprep.subr.bf16.mxu1 %v4252_v0 }
 0x3a4   :  { %3813 = vmatpush3.bf16.msra.mxu1 %v4458_v43 }
 0x3a5   :  { %3814 = vmatprep.subr.bf16.mxu1 %v4252_v0 }
 0x3a8   :  { %3816 = vmatpush3.bf16.msra.mxu1 %v4534_v14 }
 0x3a9   :  { %3817 = vmatprep.subr.bf16.mxu1 %v4252_v0 }
 0x3ac   :  { %3819 = vmatpush3.bf16.msra.mxu1 %v4539_v17 }
 0x3ad   :  { %3820 = vmatprep.subr.bf16.mxu1 %v4252_v0 }
 0x3b0   :  { %3822 = vmatpush3.bf16.msra.mxu1 %v4543_v20 }
 0x3b1   :  { %3847 = vmatprep.subr.bf16.mxu1 %v4252_v0 }
 0x426   :  { %v780_v62 = vpop.f32.mrb[6].mxu1 }
 0x427   :  { %v2848_v2 = vpop.f32.mrb[7].mxu1 }
 0x428   :  { %v2006_v2 = vld [vmem:[#allocation7 + $0x28] sm:$0xff] }
 0x446   :  { %v922_v5 = vpop.f32.mrb[8].mxu1 }
 0x447   :  { %v923_v8 = vadd.f32 %v922_v5, %v780_v62  ;;  %v2918_v11 = vpop.f32.mrb[9].mxu1 }
 0x449   :  { %v926_v13 = vadd.f32 %v4645_v23, %v923_v8  ;;  %v2008_v8 = vld [vmem:[#allocation7 + $0x38] sm:$0xff] }
 0x44b   :  { %4130 = vtanh.f32 %v926_v13  ;;  %v2009_v13 = vld [vmem:[#allocation7 + $0x40] sm:$0xff] }
 0x455   :  { %v4131_v15 = vpop.eup %4130 }
 0x456   :  { %2952 = vmatmul.mubr.f32.vlgmr.msra.gmra.mrb[16].mxu0 %v4131_v15  ;;  %v2010_v15 = vld [vmem:[#allocation7 + $0x48] sm:$0xff] }
 0x457   :  { %3777 = vmatpush3.bf16.msra.mxu0 %v4552_v25  ;;  %3021 = vmatprep.mubr.msk.f32.mxu0 %vm4253_vm0, %v4254_v1 }
 0x458   :  { %3778 = vmatprep.subr.bf16.mxu0 %v4252_v0 }
 0x45b   :  { %3780 = vmatpush3.bf16.msra.mxu0 %v4558_v29 }
 0x45c   :  { %3781 = vmatprep.subr.bf16.mxu0 %v4252_v0 }
 0x45f   :  { %3783 = vmatpush3.bf16.msra.mxu0 %v4564_v32 }
 0x460   :  { %3784 = vmatprep.subr.bf16.mxu0 %v4252_v0 }
 0x463   :  { %3786 = vmatpush3.bf16.msra.mxu0 %v4568_v36 }
 0x464   :  { %3787 = vmatprep.subr.bf16.mxu0 %v4252_v0 }
 0x466   :  { %v1064_v16 = vpop.f32.mrb[10].mxu1 }
 0x467   :  { %v1068_v18 = vadd.f32 %v1064_v16, %v4594_v60  ;;  %3789 = vmatpush3.bf16.msra.mxu0 %v4572_v40  ;;  %v2988_v19 = vpop.f32.mrb[11].mxu1  ;;  %v4100_v16 = vpack.c.bf16 %v2010_v15, %v2009_v13 }
 0x468   :  { %3790 = vmatprep.subr.bf16.mxu0 %v4252_v0  ;;  %v2012_v19 = vld [vmem:[#allocation7 + $0x58] sm:$0xff] }
 0x469   :  { %4132 = vtanh.f32 %v1068_v18  ;;  %v2011_v18 = vld [vmem:[#allocation7 + $0x50] sm:$0xff] }
 0x46b   :  { %3792 = vmatpush3.bf16.msra.mxu0 %v4577_v44 }
 0x46c   :  { %3793 = vmatprep.subr.bf16.mxu0 %v4252_v0 }
 0x46f   :  { %3795 = vmatpush3.bf16.msra.mxu0 %v4581_v50 }
 0x470   :  { %3796 = vmatprep.subr.bf16.mxu0 %v4252_v0 }
 0x473   :  { %v4133_v21 = vpop.eup %4132  ;;  %3798 = vmatpush3.bf16.msra.mxu0 %v4584_v52 }
 0x474   :  { %3823 = vmatprep.subr.bf16.mxu0 %v4252_v0 }
 0x476   :  { %3022 = vmatmul.mubr.f32.vlgmr.msra.gmra.mrb[18].mxu0 %v4133_v21 }
 0x477   :  { %3825 = vmatpush3.bf16.msra.mxu0 %v4464_v45  ;;  %3091 = vmatprep.mubr.msk.f32.mxu0 %vm4253_vm0, %v4254_v1 }
 0x478   :  { %3826 = vmatprep.subr.bf16.mxu0 %v4252_v0 }
 0x47b   :  { %3828 = vmatpush3.bf16.msra.mxu0 %v4473_v49 }
 0x47c   :  { %3829 = vmatprep.subr.bf16.mxu0 %v4252_v0 }
 0x47f   :  { %3831 = vmatpush3.bf16.msra.mxu0 %v4483_v54 }
 0x480   :  { %3832 = vmatprep.subr.bf16.mxu0 %v4252_v0 }
 0x483   :  { %3834 = vmatpush3.bf16.msra.mxu0 %v4493_v59 }
 0x484   :  { %3835 = vmatprep.subr.bf16.mxu0 %v4252_v0 }
 0x487   :  { %3837 = vmatpush3.bf16.msra.mxu0 %v4500_v63 }
 0x488   :  { %3838 = vmatprep.subr.bf16.mxu0 %v4252_v0 }
 0x48b   :  { %3840 = vmatpush3.bf16.msra.mxu0 %v4506_v4 }
 0x48c   :  { %3841 = vmatprep.subr.bf16.mxu0 %v4252_v0 }
 0x48f   :  { %3843 = vmatpush3.bf16.msra.mxu0 %v4510_v7 }
 0x490   :  { %3844 = vmatprep.subr.bf16.mxu0 %v4252_v0 }
 0x493   :  { %3846 = vmatpush3.bf16.msra.mxu0 %v4514_v10 }
 0x494   :  { %3871 = vmatprep.subr.bf16.mxu0 %v4252_v0 }
 0x496   :  { %3092 = vmatmul.mubr.f32.vlgmr.msra.gmra.mrb[20].mxu0 %v4133_v21  ;;  %v4103_v21 = vpack.c.bf16 %v2012_v19, %v2011_v18 }
 0x497   :  { %3873 = vmatpush3.bf16.msra.mxu0 %v4431_v24  ;;  %3161 = vmatprep.mubr.msk.f32.mxu0 %vm4253_vm0, %v4254_v1 }
 0x498   :  { %3874 = vmatprep.subr.bf16.mxu0 %v4252_v0 }
 0x49b   :  { %3876 = vmatpush3.bf16.msra.mxu0 %v4437_v27 }
 0x49c   :  { %3877 = vmatprep.subr.bf16.mxu0 %v4252_v0 }
 0x49f   :  { %3879 = vmatpush3.bf16.msra.mxu0 %v4447_v33 }
 0x4a0   :  { %3880 = vmatprep.subr.bf16.mxu0 %v4252_v0 }
 0x4a3   :  { %3882 = vmatpush3.bf16.msra.mxu0 %v4454_v38 }
 0x4a4   :  { %3883 = vmatprep.subr.bf16.mxu0 %v4252_v0 }
 0x4a7   :  { %3885 = vmatpush3.bf16.msra.mxu0 %v4458_v43 }
 0x4a8   :  { %3886 = vmatprep.subr.bf16.mxu0 %v4252_v0 }
 0x4ab   :  { %3888 = vmatpush3.bf16.msra.mxu0 %v4534_v14 }
 0x4ac   :  { %3889 = vmatprep.subr.bf16.mxu0 %v4252_v0 }
 0x4af   :  { %3891 = vmatpush3.bf16.msra.mxu0 %v4539_v17 }
 0x4b0   :  { %3892 = vmatprep.subr.bf16.mxu0 %v4252_v0 }
 0x4b3   :  { %3894 = vmatpush3.bf16.msra.mxu0 %v4543_v20 }
 0x4b4   :  { %3919 = vmatprep.subr.bf16.mxu0 %v4252_v0 }
 0x529   :  { %v994_v60 = vpop.f32.mrb[16].mxu0 }
 0x52a   :  { %v2953_v22 = vpop.f32.mrb[17].mxu0 }
 0x52b   :  { %v2014_v22 = vld [vmem:[#allocation7 + $0x68] sm:$0xff] }
 0x549   :  { %v1136_v26 = vpop.f32.mrb[18].mxu0 }
 0x54a   :  { %v1137_v28 = vadd.f32 %v1136_v26, %v994_v60  ;;  %v3023_v30 = vpop.f32.mrb[19].mxu0  ;;  %v2013_v60 = vld [vmem:[#allocation7 + $0x60] sm:$0xff] }
 0x54b   :  { %v4106_v26 = vpack.c.bf16 %v2014_v22, %v2013_v60  ;;  %v2016_v30 = vld [vmem:[#allocation7 + $0x78] sm:$0xff] }
 0x54c   :  { %v1140_v31 = vadd.f32 %v4645_v23, %v1137_v28  ;;  %v2015_v28 = vld [vmem:[#allocation7 + $0x70] sm:$0xff] }
 0x54e   :  { %4134 = vtanh.f32 %v1140_v31  ;;  %v4109_v31 = vpack.c.bf16 %v2016_v30, %v2015_v28 }
 0x558   :  { %v4135_v34 = vpop.eup %4134 }
 0x559   :  { %3057 = vmatmul.mubr.f32.vlgmr.msra.gmra.mrb[12].mxu1 %v4135_v34 }
 0x55a   :  { %3849 = vmatpush3.bf16.msra.mxu1 %v4552_v25  ;;  %3126 = vmatprep.mubr.msk.f32.mxu1 %vm4253_vm0, %v4254_v1 }
 0x55b   :  { %3850 = vmatprep.subr.bf16.mxu1 %v4252_v0 }
 0x55e   :  { %3852 = vmatpush3.bf16.msra.mxu1 %v4558_v29 }
 0x55f   :  { %3853 = vmatprep.subr.bf16.mxu1 %v4252_v0 }
 0x562   :  { %3855 = vmatpush3.bf16.msra.mxu1 %v4564_v32 }
 0x563   :  { %3856 = vmatprep.subr.bf16.mxu1 %v4252_v0 }
 0x566   :  { %3858 = vmatpush3.bf16.msra.mxu1 %v4568_v36 }
 0x567   :  { %3859 = vmatprep.subr.bf16.mxu1 %v4252_v0 }
 0x569   :  { %v1278_v35 = vpop.f32.mrb[20].mxu0 }
 0x56a   :  { %v1282_v37 = vadd.f32 %v1278_v35, %v4600_v6  ;;  %3861 = vmatpush3.bf16.msra.mxu1 %v4572_v40  ;;  %v3093_v39 = vpop.f32.mrb[21].mxu0 }
 0x56b   :  { %3862 = vmatprep.subr.bf16.mxu1 %v4252_v0 }
 0x56c   :  { %4136 = vtanh.f32 %v1282_v37 }
 0x56e   :  { %3864 = vmatpush3.bf16.msra.mxu1 %v4577_v44 }
 0x56f   :  { %3865 = vmatprep.subr.bf16.mxu1 %v4252_v0 }
 0x572   :  { %3867 = vmatpush3.bf16.msra.mxu1 %v4581_v50 }
 0x573   :  { %3868 = vmatprep.subr.bf16.mxu1 %v4252_v0 }
 0x576   :  { %v4137_v41 = vpop.eup %4136  ;;  %3870 = vmatpush3.bf16.msra.mxu1 %v4584_v52 }
 0x577   :  { %3895 = vmatprep.subr.bf16.mxu1 %v4252_v0 }
 0x579   :  { %3127 = vmatmul.mubr.f32.vlgmr.msra.gmra.mrb[14].mxu1 %v4137_v41 }
 0x57a   :  { %3897 = vmatpush3.bf16.msra.mxu1 %v4464_v45  ;;  %3196 = vmatprep.mubr.msk.f32.mxu1 %vm4253_vm0, %v4254_v1 }
 0x57b   :  { %3898 = vmatprep.subr.bf16.mxu1 %v4252_v0 }
 0x57e   :  { %3900 = vmatpush3.bf16.msra.mxu1 %v4473_v49 }
 0x57f   :  { %3901 = vmatprep.subr.bf16.mxu1 %v4252_v0 }
 0x582   :  { %3903 = vmatpush3.bf16.msra.mxu1 %v4483_v54 }
 0x583   :  { %3904 = vmatprep.subr.bf16.mxu1 %v4252_v0 }
 0x586   :  { %3906 = vmatpush3.bf16.msra.mxu1 %v4493_v59 }
 0x587   :  { %3907 = vmatprep.subr.bf16.mxu1 %v4252_v0 }
 0x58a   :  { %3909 = vmatpush3.bf16.msra.mxu1 %v4500_v63 }
 0x58b   :  { %3910 = vmatprep.subr.bf16.mxu1 %v4252_v0 }
 0x58e   :  { %3912 = vmatpush3.bf16.msra.mxu1 %v4506_v4 }
 0x58f   :  { %3913 = vmatprep.subr.bf16.mxu1 %v4252_v0 }
 0x592   :  { %3915 = vmatpush3.bf16.msra.mxu1 %v4510_v7 }
 0x593   :  { %3916 = vmatprep.subr.bf16.mxu1 %v4252_v0 }
 0x596   :  { %3918 = vmatpush3.bf16.msra.mxu1 %v4514_v10 }
 0x597   :  { %3943 = vmatprep.subr.bf16.mxu1 %v4252_v0 }
 0x599   :  { %3197 = vmatmul.mubr.f32.vlgmr.msra.gmra.mrb[16].mxu1 %v4137_v41 }
 0x59a   :  { %3945 = vmatpush3.bf16.msra.mxu1 %v4431_v24  ;;  %3266 = vmatprep.mubr.msk.f32.mxu1 %vm4253_vm0, %v4254_v1 }
 0x59b   :  { %3946 = vmatprep.subr.bf16.mxu1 %v4252_v0 }
 0x59e   :  { %3948 = vmatpush3.bf16.msra.mxu1 %v4437_v27 }
 0x59f   :  { %3949 = vmatprep.subr.bf16.mxu1 %v4252_v0 }
 0x5a2   :  { %3951 = vmatpush3.bf16.msra.mxu1 %v4447_v33 }
 0x5a3   :  { %3952 = vmatprep.subr.bf16.mxu1 %v4252_v0 }
 0x5a6   :  { %3954 = vmatpush3.bf16.msra.mxu1 %v4454_v38 }
 0x5a7   :  { %3955 = vmatprep.subr.bf16.mxu1 %v4252_v0 }
 0x5aa   :  { %3957 = vmatpush3.bf16.msra.mxu1 %v4458_v43 }
 0x5ab   :  { %3958 = vmatprep.subr.bf16.mxu1 %v4252_v0 }
 0x5ae   :  { %3960 = vmatpush3.bf16.msra.mxu1 %v4534_v14 }
 0x5af   :  { %3961 = vmatprep.subr.bf16.mxu1 %v4252_v0 }
 0x5b2   :  { %3963 = vmatpush3.bf16.msra.mxu1 %v4539_v17 }
 0x5b3   :  { %3964 = vmatprep.subr.bf16.mxu1 %v4252_v0 }
 0x5b6   :  { %3966 = vmatpush3.bf16.msra.mxu1 %v4543_v20 }
 0x5b7   :  { %3991 = vmatprep.subr.bf16.mxu1 %v4252_v0 }
 0x62c   :  { %v1208_v6 = vpop.f32.mrb[12].mxu1 }
 0x62d   :  { %v3058_v42 = vpop.f32.mrb[13].mxu1 }
 0x64c   :  { %v1350_v46 = vpop.f32.mrb[14].mxu1 }
 0x64d   :  { %v1351_v47 = vadd.f32 %v1350_v46, %v1208_v6  ;;  %v3128_v48 = vpop.f32.mrb[15].mxu1 }
 0x64f   :  { %v1354_v51 = vadd.f32 %v4645_v23, %v1351_v47 }
 0x651   :  { %4138 = vtanh.f32 %v1354_v51 }
 0x65b   :  { %v4139_v53 = vpop.eup %4138 }
 0x65c   :  { %3162 = vmatmul.mubr.f32.vlgmr.msra.gmra.mrb[22].mxu0 %v4139_v53 }
 0x65d   :  { %3921 = vmatpush3.bf16.msra.mxu0 %v4552_v25  ;;  %3231 = vmatprep.mubr.msk.f32.mxu0 %vm4253_vm0, %v4254_v1 }
 0x65e   :  { %3922 = vmatprep.subr.bf16.mxu0 %v4252_v0 }
 0x661   :  { %3924 = vmatpush3.bf16.msra.mxu0 %v4558_v29 }
 0x662   :  { %3925 = vmatprep.subr.bf16.mxu0 %v4252_v0 }
 0x665   :  { %3927 = vmatpush3.bf16.msra.mxu0 %v4564_v32 }
 0x666   :  { %3928 = vmatprep.subr.bf16.mxu0 %v4252_v0 }
 0x669   :  { %3930 = vmatpush3.bf16.msra.mxu0 %v4568_v36 }
 0x66a   :  { %3931 = vmatprep.subr.bf16.mxu0 %v4252_v0 }
 0x66c   :  { %v1492_v55 = vpop.f32.mrb[16].mxu1 }
 0x66d   :  { %v1496_v56 = vadd.f32 %v1492_v55, %v4598_v3  ;;  %3933 = vmatpush3.bf16.msra.mxu0 %v4572_v40  ;;  %v3198_v57 = vpop.f32.mrb[17].mxu1 }
 0x66e   :  { %3934 = vmatprep.subr.bf16.mxu0 %v4252_v0 }
 0x66f   :  { %4140 = vtanh.f32 %v1496_v56 }
 0x671   :  { %3936 = vmatpush3.bf16.msra.mxu0 %v4577_v44 }
 0x672   :  { %3937 = vmatprep.subr.bf16.mxu0 %v4252_v0 }
 0x675   :  { %3939 = vmatpush3.bf16.msra.mxu0 %v4581_v50 }
 0x676   :  { %3940 = vmatprep.subr.bf16.mxu0 %v4252_v0 }
 0x679   :  { %v4141_v58 = vpop.eup %4140  ;;  %3942 = vmatpush3.bf16.msra.mxu0 %v4584_v52 }
 0x67a   :  { %3967 = vmatprep.subr.bf16.mxu0 %v4252_v0 }
 0x67c   :  { %3232 = vmatmul.mubr.f32.vlgmr.msra.gmra.mrb[24].mxu0 %v4141_v58 }
 0x67d   :  { %3969 = vmatpush3.bf16.msra.mxu0 %v4464_v45  ;;  %3301 = vmatprep.mubr.msk.f32.mxu0 %vm4253_vm0, %v4254_v1 }
 0x67e   :  { %3970 = vmatprep.subr.bf16.mxu0 %v4252_v0 }
 0x681   :  { %3972 = vmatpush3.bf16.msra.mxu0 %v4473_v49 }
 0x682   :  { %3973 = vmatprep.subr.bf16.mxu0 %v4252_v0 }
 0x685   :  { %3975 = vmatpush3.bf16.msra.mxu0 %v4483_v54 }
 0x686   :  { %3976 = vmatprep.subr.bf16.mxu0 %v4252_v0 }
 0x689   :  { %3978 = vmatpush3.bf16.msra.mxu0 %v4493_v59 }
 0x68a   :  { %3979 = vmatprep.subr.bf16.mxu0 %v4252_v0 }
 0x68d   :  { %3981 = vmatpush3.bf16.msra.mxu0 %v4500_v63 }
 0x68e   :  { %3982 = vmatprep.subr.bf16.mxu0 %v4252_v0 }
 0x691   :  { %3984 = vmatpush3.bf16.msra.mxu0 %v4506_v4 }
 0x692   :  { %3985 = vmatprep.subr.bf16.mxu0 %v4252_v0 }
 0x695   :  { %3987 = vmatpush3.bf16.msra.mxu0 %v4510_v7 }
 0x696   :  { %3988 = vmatprep.subr.bf16.mxu0 %v4252_v0 }
 0x699   :  { %3990 = vmatpush3.bf16.msra.mxu0 %v4514_v10 }
 0x69a   :  { %4015 = vmatprep.subr.bf16.mxu0 %v4252_v0 }
 0x69c   :  { %3302 = vmatmul.mubr.f32.vlgmr.msra.gmra.mrb[26].mxu0 %v4141_v58 }
 0x69d   :  { %4017 = vmatpush3.bf16.msra.mxu0 %v4431_v24  ;;  %3371 = vmatprep.mubr.msk.f32.mxu0 %vm4253_vm0, %v4254_v1 }
 0x69e   :  { %4018 = vmatprep.subr.bf16.mxu0 %v4252_v0 }
 0x6a1   :  { %4020 = vmatpush3.bf16.msra.mxu0 %v4437_v27 }
 0x6a2   :  { %4021 = vmatprep.subr.bf16.mxu0 %v4252_v0 }
 0x6a5   :  { %4023 = vmatpush3.bf16.msra.mxu0 %v4447_v33 }
 0x6a6   :  { %4024 = vmatprep.subr.bf16.mxu0 %v4252_v0 }
 0x6a9   :  { %4026 = vmatpush3.bf16.msra.mxu0 %v4454_v38 }
 0x6aa   :  { %4027 = vmatprep.subr.bf16.mxu0 %v4252_v0 }
 0x6ad   :  { %4029 = vmatpush3.bf16.msra.mxu0 %v4458_v43 }
 0x6ae   :  { %4030 = vmatprep.subr.bf16.mxu0 %v4252_v0 }
 0x6b1   :  { %4032 = vmatpush3.bf16.msra.mxu0 %v4534_v14 }
 0x6b2   :  { %4033 = vmatprep.subr.bf16.mxu0 %v4252_v0 }
 0x6b5   :  { %4035 = vmatpush3.bf16.msra.mxu0 %v4539_v17 }
 0x6b6   :  { %4036 = vmatprep.subr.bf16.mxu0 %v4252_v0 }
 0x6b9   :  { %4038 = vmatpush3.bf16.msra.mxu0 %v4543_v20 }
 0x6ba   :  { %4063 = vmatprep.subr.bf16.mxu0 %v4252_v0 }
 0x72f   :  { %v1422_v24 = vpop.f32.mrb[22].mxu0 }
 0x730   :  { %v3163_v27 = vpop.f32.mrb[23].mxu0 }
 0x74f   :  { %v1564_v33 = vpop.f32.mrb[24].mxu0 }
 0x750   :  { %v1565_v38 = vadd.f32 %v1564_v33, %v1422_v24  ;;  %v3233_v3 = vpop.f32.mrb[25].mxu0 }
 0x752   :  { %v1568_v43 = vadd.f32 %v4645_v23, %v1565_v38 }
 0x754   :  { %4142 = vtanh.f32 %v1568_v43 }
 0x75e   :  { %v4143_v61 = vpop.eup %4142 }
 0x75f   :  { %3267 = vmatmul.mubr.f32.vlgmr.msra.gmra.mrb[18].mxu1 %v4143_v61 }
 0x760   :  { %3993 = vmatpush3.bf16.msra.mxu1 %v4552_v25  ;;  %3336 = vmatprep.mubr.msk.f32.mxu1 %vm4253_vm0, %v4254_v1 }
 0x761   :  { %3994 = vmatprep.subr.bf16.mxu1 %v4252_v0 }
 0x764   :  { %3996 = vmatpush3.bf16.msra.mxu1 %v4558_v29 }
 0x765   :  { %3997 = vmatprep.subr.bf16.mxu1 %v4252_v0 }
 0x768   :  { %3999 = vmatpush3.bf16.msra.mxu1 %v4564_v32 }
 0x769   :  { %4000 = vmatprep.subr.bf16.mxu1 %v4252_v0 }
 0x76c   :  { %4002 = vmatpush3.bf16.msra.mxu1 %v4568_v36 }
 0x76d   :  { %4003 = vmatprep.subr.bf16.mxu1 %v4252_v0 }
 0x76f   :  { %v1706_v14 = vpop.f32.mrb[26].mxu0 }
 0x770   :  { %v1710_v17 = vadd.f32 %v1706_v14, %v4604_v12  ;;  %4005 = vmatpush3.bf16.msra.mxu1 %v4572_v40  ;;  %v3303_v20 = vpop.f32.mrb[27].mxu0 }
 0x771   :  { %4006 = vmatprep.subr.bf16.mxu1 %v4252_v0 }
 0x772   :  { %4144 = vtanh.f32 %v1710_v17 }
 0x774   :  { %4008 = vmatpush3.bf16.msra.mxu1 %v4577_v44 }
 0x775   :  { %4009 = vmatprep.subr.bf16.mxu1 %v4252_v0 }
 0x778   :  { %4011 = vmatpush3.bf16.msra.mxu1 %v4581_v50 }
 0x779   :  { %4012 = vmatprep.subr.bf16.mxu1 %v4252_v0 }
 0x77c   :  { %v4145_v62 = vpop.eup %4144  ;;  %4014 = vmatpush3.bf16.msra.mxu1 %v4584_v52 }
 0x77d   :  { %4039 = vmatprep.subr.bf16.mxu1 %v4252_v0 }
 0x77f   :  { %3337 = vmatmul.mubr.f32.vlgmr.msra.gmra.mrb[20].mxu1 %v4145_v62 }
 0x780   :  { %4041 = vmatpush3.bf16.msra.mxu1 %v4464_v45  ;;  %3406 = vmatprep.mubr.msk.f32.mxu1 %vm4253_vm0, %v4254_v1 }
 0x781   :  { %4042 = vmatprep.subr.bf16.mxu1 %v4252_v0 }
 0x784   :  { %4044 = vmatpush3.bf16.msra.mxu1 %v4473_v49 }
 0x785   :  { %4045 = vmatprep.subr.bf16.mxu1 %v4252_v0 }
 0x788   :  { %4047 = vmatpush3.bf16.msra.mxu1 %v4483_v54 }
 0x789   :  { %4048 = vmatprep.subr.bf16.mxu1 %v4252_v0 }
 0x78c   :  { %4050 = vmatpush3.bf16.msra.mxu1 %v4493_v59 }
 0x78d   :  { %4051 = vmatprep.subr.bf16.mxu1 %v4252_v0 }
 0x790   :  { %4053 = vmatpush3.bf16.msra.mxu1 %v4500_v63 }
 0x791   :  { %4054 = vmatprep.subr.bf16.mxu1 %v4252_v0 }
 0x794   :  { %4056 = vmatpush3.bf16.msra.mxu1 %v4506_v4 }
 0x795   :  { %4057 = vmatprep.subr.bf16.mxu1 %v4252_v0 }
 0x798   :  { %4059 = vmatpush3.bf16.msra.mxu1 %v4510_v7 }
 0x799   :  { %4060 = vmatprep.subr.bf16.mxu1 %v4252_v0 }
 0x79c   :  { %4062 = vmatpush3.bf16.msra.mxu1 %v4514_v10 }
 0x79d   :  { %4087 = vmatprep.subr.bf16.mxu1 %v4252_v0 }
 0x79f   :  { %3407 = vmatmul.mubr.f32.vlgmr.msra.gmra.mrb[22].mxu1 %v4145_v62 }
 0x7a0   :  { %3476 = vmatprep.mubr.msk.f32.mxu1 %vm4253_vm0, %v4254_v1 }
 0x832   :  { %v1636_v45 = vpop.f32.mrb[18].mxu1 }
 0x833   :  { %v3268_v49 = vpop.f32.mrb[19].mxu1 }
 0x852   :  { %v1778_v54 = vpop.f32.mrb[20].mxu1 }
 0x853   :  { %v1779_v59 = vadd.f32 %v1778_v54, %v1636_v45  ;;  %v3338_v63 = vpop.f32.mrb[21].mxu1 }
 0x855   :  { %v1782_v4 = vadd.f32 %v4645_v23, %v1779_v59 }
 0x857   :  { %4146 = vtanh.f32 %v1782_v4 }
 0x861   :  { %v4147_v12 = vpop.eup %4146 }
 0x862   :  { %3372 = vmatmul.mubr.f32.vlgmr.msra.gmra.mrb[28].mxu0 %v4147_v12 }
 0x863   :  { %4065 = vmatpush3.bf16.msra.mxu0 %v4552_v25  ;;  %3441 = vmatprep.mubr.msk.f32.mxu0 %vm4253_vm0, %v4254_v1 }
 0x864   :  { %4066 = vmatprep.subr.bf16.mxu0 %v4252_v0 }
 0x867   :  { %4068 = vmatpush3.bf16.msra.mxu0 %v4558_v29  ;;  %v2001_v29 = vld [vmem:[#allocation7] sm:$0xff] }
 0x868   :  { %4069 = vmatprep.subr.bf16.mxu0 %v4252_v0 }
 0x86b   :  { %4071 = vmatpush3.bf16.msra.mxu0 %v4564_v32  ;;  %v2002_v32 = vld [vmem:[#allocation7 + $0x8] sm:$0xff] }
 0x86c   :  { %4072 = vmatprep.subr.bf16.mxu0 %v4252_v0 }
 0x86f   :  { %4074 = vmatpush3.bf16.msra.mxu0 %v4568_v36  ;;  %v2003_v36 = vld [vmem:[#allocation7 + $0x10] sm:$0xff] }
 0x870   :  { %4075 = vmatprep.subr.bf16.mxu0 %v4252_v0 }
 0x872   :  { %v1920_v7 = vpop.f32.mrb[22].mxu1 }
 0x873   :  { %v1924_v10 = vadd.f32 %v1920_v7, %v4602_v9  ;;  %4077 = vmatpush3.bf16.msra.mxu0 %v4572_v40  ;;  %v3408_v1 = vpop.f32.mrb[23].mxu1  ;;  %v4088_v40 = vpack.c.bf16 %v2002_v32, %v2001_v29  ;;  %v2004_v9 = vld [vmem:[#allocation7 + $0x18] sm:$0xff] }
 0x874   :  { %4078 = vmatprep.subr.bf16.mxu0 %v4252_v0 }
 0x875   :  { %4148 = vtanh.f32 %v1924_v10  ;;  %4089 = vmatpush3.bf16.msra.mxu1 %v4088_v40 }
 0x876   :  { %4090 = vmatprep.subr.bf16.mxu1 %v4252_v0 }
 0x877   :  { %4080 = vmatpush3.bf16.msra.mxu0 %v4577_v44  ;;  %v4091_v44 = vpack.c.bf16 %v2004_v9, %v2003_v36 }
 0x878   :  { %4081 = vmatprep.subr.bf16.mxu0 %v4252_v0 }
 0x879   :  { %4092 = vmatpush3.bf16.msra.mxu1 %v4091_v44 }
 0x87a   :  { %4093 = vmatprep.subr.bf16.mxu1 %v4252_v0 }
 0x87b   :  { %4083 = vmatpush3.bf16.msra.mxu0 %v4581_v50  ;;  %v2005_v50 = vld [vmem:[#allocation7 + $0x20] sm:$0xff] }
 0x87c   :  { %4084 = vmatprep.subr.bf16.mxu0 %v4252_v0  ;;  %v4094_v5 = vpack.c.bf16 %v2006_v2, %v2005_v50 }
 0x87e   :  { %4095 = vmatpush3.bf16.msra.mxu1 %v4094_v5 }
 0x87f   :  { %v4149_v25 = vpop.eup %4148  ;;  %4086 = vmatpush3.bf16.msra.mxu0 %v4584_v52  ;;  %v2007_v52 = vld [vmem:[#allocation7 + $0x30] sm:$0xff]  ;;  %4096 = vmatprep.subr.bf16.mxu1 %v4252_v0 }
 0x880   :  { %1998 = vst [vmem:[%s5017_s11] sm:$0xff] %v4149_v25  ;;  %v4097_v11 = vpack.c.bf16 %v2008_v8, %v2007_v52 }
 0x882   :  { %3442 = vmatmul.mubr.f32.vlgmr.msra.gmra.mrb[30].mxu0 %v4149_v25  ;;  %4098 = vmatpush3.bf16.msra.mxu1 %v4097_v11 }
 0x883   :  { %4099 = vmatprep.subr.bf16.mxu1 %v4252_v0 }
 0x886   :  { %4101 = vmatpush3.bf16.msra.mxu1 %v4100_v16 }
 0x887   :  { %4102 = vmatprep.subr.bf16.mxu1 %v4252_v0 }
 0x88a   :  { %4104 = vmatpush3.bf16.msra.mxu1 %v4103_v21 }
 0x88b   :  { %4105 = vmatprep.subr.bf16.mxu1 %v4252_v0 }
 0x88e   :  { %4107 = vmatpush3.bf16.msra.mxu1 %v4106_v26 }
 0x88f   :  { %4108 = vmatprep.subr.bf16.mxu1 %v4252_v0  ;;  %v2110_v0 = vld [vmem:[%s5015_s9] ss:$0 sm:$0xff] }
 0x892   :  { %4110 = vmatpush3.bf16.msra.mxu1 %v4109_v31 }
 0x935   :  { %v1850_v34 = vpop.f32.mrb[28].mxu0 }
 0x936   :  { %v3373_v35 = vpop.f32.mrb[29].mxu0 }
 0x955   :  { %v1992_v37 = vpop.f32.mrb[30].mxu0 }
 0x956   :  { %v1993_v39 = vadd.f32 %v1992_v37, %v1850_v34  ;;  %v3443_v41 = vpop.f32.mrb[31].mxu0 }
 0x958   :  { %v1996_v6 = vadd.f32 %v4645_v23, %v1993_v39 }
 0x95a   :  { %4150 = vtanh.f32 %v1996_v6 }
 0x964   :  { %v4151_v42 = vpop.eup %4150 }
 0x965   :  { %2109 = vst [vmem:[%s5017_s11 + $0x8] sm:$0xff] %v4151_v42  ;;  %3477 = vmatmul.mubr.f32.vlgmr.msra.gmra.mrb[24].mxu1 %v4151_v42 }
 0xa38   :  { %v2090_v46 = vpop.f32.mrb[24].mxu1 }
 0xa39   :  { %v2091_v47 = vadd.f32 %v2110_v0, %v2090_v46  ;;  %v3478_v48 = vpop.f32.mrb[25].mxu1 }
 0xa3b   :  { %2094 = vst [vmem:[%s5016_s10] sm:$0xff] %v2091_v47 }
 0xa3c   :  { %2103 = vsyncpa [#allocation3], 1 }
 0xa3d   :  { %2104 = vsyncpa [#allocation5], 1 }
 0xa3e   :  { %2105 = vsyncpa [#allocation8], 1 }

</bundles_post_ra>
